<compile_context>
chip_gen: v7x
topology: tpu7x:2x2x1
jax: 0.10.0
libtpu: 0.0.40
codegen_flags: <defaults>
</compile_context>

<pallas_src>
import functools

import jax
import jax.numpy as jnp
from jax import lax
from jax.experimental import pallas as pl
from jax.experimental.pallas import tpu as pltpu

LANE = 128


def _largest_divisor_leq(n, cap):
    """Largest divisor of n that is <= cap (>= 1)."""
    cap = max(1, min(n, cap))
    for d in range(cap, 0, -1):
        if n % d == 0:
            return d
    return 1


def _make_conv_kernel(*, stride, KH, KW, TH, Wo, Cin, Cout, Cp):
    rows_in = (TH - 1) * stride + KH  # input rows needed per output row tile (incl. halo)

    def conv_kernel(x_ref, w_ref, y_ref, s_ref, q_ref, pm_ref):
        # x_ref : (Hp, Wp, Cin)        bf16  padded image of this batch element
        # w_ref : (KH*KW*Cin, Cp)      bf16  im2col weights, Cout zero-padded to Cp lanes
        # y_ref : (TH, Wo, Cout)       f32   conv output row tile (unpadded channels)
        # s_ref : (1, Cp)              f32   per-tile sum   (BN stats partial)
        # q_ref : (1, Cp)              f32   per-tile sumsq (BN stats partial)
        # pm_ref: (TH*Wo, KH*KW*Cin)   bf16  im2col patch-matrix scratch
        r = pl.program_id(1)
        row0 = r * (TH * stride)
        if (TH * stride) % 8 == 0:
            row0 = pl.multiple_of(row0, 8)

        # Ref-slice: load only the rows this tile needs; keep bf16 (no full-image cast).
        xin = x_ref[pl.ds(row0, rows_in), :, :]                  # (rows_in, Wp, Cin) bf16

        # Assemble the im2col patch matrix: one (TH*Wo, Cin) column block per tap.
        for kh in range(KH):
            for kw in range(KW):
                patch = lax.slice(
                    xin,
                    (kh, kw, 0),
                    (kh + (TH - 1) * stride + 1, kw + (Wo - 1) * stride + 1, Cin),
                    (stride, stride, 1),
                )                                                # (TH, Wo, Cin) bf16
                c0 = (kh * KW + kw) * Cin
                pm_ref[:, c0:c0 + Cin] = patch.reshape(TH * Wo, Cin)

        # Single MXU contraction, f32 accumulate: (TH*Wo, K) x (K, Cp).
        acc = jnp.dot(pm_ref[...], w_ref[...], preferred_element_type=jnp.float32)

        # Unpadded-channel store: padding columns are exactly zero and never leave VMEM.
        y_ref[...] = acc.reshape(TH, Wo, Cp)[:, :, :Cout]

        # BN batch-stat partials while acc is still live (avoids re-reading conv_out).
        s_ref[...] = jnp.sum(acc, axis=0, keepdims=True)
        q_ref[...] = jnp.sum(acc * acc, axis=0, keepdims=True)

    return conv_kernel


def _bn_apply_kernel(y_ref, scale_ref, shift_ref, o_ref):
    # y_ref/o_ref: (TH2, Wo, Cout) f32 ; scale/shift: (1, Cout) f32
    o_ref[...] = jnp.maximum(y_ref[...] * scale_ref[...] + shift_ref[...], 0.0)


def conv_block_forward(x_nchw, w_oihw, bias, gamma, beta, *, stride=1, padding=0, eps=1e-5):
    """Forward pass of ConvBlock (train-mode BN). Inputs follow PyTorch NCHW / OIHW."""
    # Train-mode BN subtracts the batch mean, so the conv bias cancels exactly in the
    # forward output; it only matters for running_mean, which this kernel doesn't model.
    del bias

    N, Cin, H, W = x_nchw.shape
    Cout, _, KH, KW = w_oihw.shape
    Cp = ((Cout + LANE - 1) // LANE) * LANE           # MXU / stats lane width (>= 128)

    # NCHW -> NHWC, spatial zero-pad, bf16 for DMA / MXU.
    x = jnp.transpose(x_nchw, (0, 2, 3, 1))
    xp = jnp.pad(x, ((0, 0), (padding, padding), (padding, padding), (0, 0)))
    xp = xp.astype(jnp.bfloat16)
    Hp, Wp = H + 2 * padding, W + 2 * padding
    Ho = (Hp - KH) // stride + 1
    Wo = (Wp - KW) // stride + 1

    # OIHW -> HWIO -> (KH*KW*Cin, Cout) im2col layout, channel-padded to Cp, bf16.
    w = jnp.transpose(w_oihw, (2, 3, 1, 0)).reshape(KH * KW * Cin, Cout)
    w = jnp.pad(w, ((0, 0), (0, Cp - Cout))).astype(jnp.bfloat16)

    # Output-row tiling: aim for an MXU M (= TH*Wo) of 256-512 rows.
    TH = _largest_divisor_leq(Ho, max(1, 512 // max(Wo, 1)))
    R = Ho // TH

    # --- Kernel 1: conv (one im2col MXU dot per tile) + fused BN-stats epilogue ---
    # Blocks here are tiny; default scoped-VMEM budget is ample on v5e/v6e/v7x (see
    # row-halo TODO above for realistic image sizes).
    conv_out, psum, psq = pl.pallas_call(
        _make_conv_kernel(stride=stride, KH=KH, KW=KW, TH=TH, Wo=Wo,
                          Cin=Cin, Cout=Cout, Cp=Cp),
        out_shape=(
            jax.ShapeDtypeStruct((N, Ho, Wo, Cout), jnp.float32),
            jax.ShapeDtypeStruct((N, R, 1, Cp), jnp.float32),
            jax.ShapeDtypeStruct((N, R, 1, Cp), jnp.float32),
        ),
        grid=(N, R),
        in_specs=[
            pl.BlockSpec((None, Hp, Wp, Cin), lambda n, r: (n, 0, 0, 0)),
            pl.BlockSpec((KH * KW * Cin, Cp), lambda n, r: (0, 0)),
        ],
        out_specs=(
            pl.BlockSpec((None, TH, Wo, Cout), lambda n, r: (n, r, 0, 0)),
            pl.BlockSpec((None, None, 1, Cp), lambda n, r: (n, r, 0, 0)),
            pl.BlockSpec((None, None, 1, Cp), lambda n, r: (n, r, 0, 0)),
        ),
        scratch_shapes=[pltpu.VMEM((TH * Wo, KH * KW * Cin), jnp.bfloat16)],
        compiler_params=pltpu.CompilerParams(
            dimension_semantics=("parallel", "parallel")),
    )(xp, w)

    # --- Tiny reduction of the (N, R, Cp) partials into per-channel scale / shift ---
    # TODO(synk): E[x^2]-E[x]^2 is cancellation-prone when |mean| >> std; with the conv
    #             bias dropped it is benign here, but a shifted/Welford reduction over the
    #             per-tile partials would be safer on real activations.
    count = jnp.float32(N * Ho * Wo)
    mean = jnp.sum(psum, axis=(0, 1, 2))[:Cout] / count
    ex2 = jnp.sum(psq, axis=(0, 1, 2))[:Cout] / count
    var = ex2 - mean * mean                           # biased var (PyTorch train-mode BN)
    scale = gamma.astype(jnp.float32) * lax.rsqrt(var + eps)
    shift = beta.astype(jnp.float32) - mean * scale

    # --- Kernel 2: BN apply + ReLU, large (VMEM-capped) blocks, in-place via aliasing ---
    TH2 = _largest_divisor_leq(Ho, max(1, (4 << 20) // max(Wo * Cout * 4, 1)))
    R2 = Ho // TH2
    out_nhwc = pl.pallas_call(
        _bn_apply_kernel,
        out_shape=jax.ShapeDtypeStruct((N, Ho, Wo, Cout), jnp.float32),
        grid=(N, R2),
        in_specs=[
            pl.BlockSpec((None, TH2, Wo, Cout), lambda n, r: (n, r, 0, 0)),
            pl.BlockSpec((1, Cout), lambda n, r: (0, 0)),
            pl.BlockSpec((1, Cout), lambda n, r: (0, 0)),
        ],
        out_specs=pl.BlockSpec((None, TH2, Wo, Cout), lambda n, r: (n, r, 0, 0)),
        input_output_aliases={0: 0},
        compiler_params=pltpu.CompilerParams(
            dimension_semantics=("parallel", "parallel")),
    )(conv_out, scale.reshape(1, Cout), shift.reshape(1, Cout))

    return jnp.transpose(out_nhwc, (0, 3, 1, 2))      # back to NCHW


def _reference(x_nchw, w_oihw, bias, gamma, beta, *, stride, padding, eps=1e-5):
    # Reference uses the same bf16-rounded conv inputs as the kernel (f32 accumulate),
    # so the comparison isolates the kernel math from the deliberate bf16 input cast.
    xr = x_nchw.astype(jnp.bfloat16).astype(jnp.float32)
    wr = w_oihw.astype(jnp.bfloat16).astype(jnp.float32)
    y = lax.conv_general_dilated(
        xr, wr,
        window_strides=(stride, stride),
        padding=[(padding, padding), (padding, padding)],
        dimension_numbers=("NCHW", "OIHW", "NCHW"),
    ) + bias.reshape(1, -1, 1, 1)
    mean = jnp.mean(y, axis=(0, 2, 3), keepdims=True)
    var = jnp.mean((y - mean) ** 2, axis=(0, 2, 3), keepdims=True)
    xhat = (y - mean) * lax.rsqrt(var + eps)
    out = xhat * gamma.reshape(1, -1, 1, 1) + beta.reshape(1, -1, 1, 1)
    return jnp.maximum(out, 0.0)


if __name__ == "__main__":
    # ConvBlock(in_channels=4, out_channels=8, kernel_size=3, stride=1, padding=1, bias=True)
    N, Cin, H, W = 2, 4, 16, 16
    Cout, K, stride, padding = 8, 3, 1, 1

    key = jax.random.PRNGKey(0)
    kx, kw, kb = jax.random.split(key, 3)
    x = jax.random.normal(kx, (N, Cin, H, W), jnp.float32)
    conv_w = jax.random.normal(kw, (Cout, Cin, K, K), jnp.float32) * 0.1
    conv_b = jax.random.normal(kb, (Cout,), jnp.float32) * 0.1
    bn_gamma = jnp.ones((Cout,), jnp.float32)   # PyTorch BatchNorm2d default init
    bn_beta = jnp.zeros((Cout,), jnp.float32)

    fwd = jax.jit(functools.partial(conv_block_forward, stride=stride, padding=padding))
    out = fwd(x, conv_w, conv_b, bn_gamma, bn_beta)
    out = jax.block_until_ready(out)

    ref = _reference(x, conv_w, conv_b, bn_gamma, bn_beta, stride=stride, padding=padding)
    assert out.shape == (N, Cout, H, W), out.shape
    max_err = float(jnp.max(jnp.abs(out - ref)))
    assert jnp.allclose(out, ref, atol=1e-3, rtol=1e-3), max_err

    print("KERNEL_OK")
</pallas_src>

<mosaic_0001>
module attributes {stable_mosaic.version = 11 : i64} {
  func.func @_bn_apply_kernel(%arg0: i32, %arg1: i32, %arg2: memref<1x16x16x8xf32, #tpu.memory_space<vmem>>, %arg3: memref<1x8xf32, #tpu.memory_space<vmem>>, %arg4: memref<1x8xf32, #tpu.memory_space<vmem>>, %arg5: memref<1x16x16x8xf32, #tpu.memory_space<vmem>>) attributes {dimension_semantics = [#tpu.dimension_semantics<parallel>, #tpu.dimension_semantics<parallel>], iteration_bounds = array<i64: 2, 1>, scalar_prefetch = 0 : i64, scratch_operands = 0 : i64, tpu.core_type = #tpu.core_type<tc>, window_params = [{transform_indices = @transform_0, window_bounds = array<i64: 1, 16, 16, 8>}, {pipeline_mode = #tpu.pipeline_mode<synchronous>, transform_indices = @transform_1, window_bounds = array<i64: 1, 8>}, {pipeline_mode = #tpu.pipeline_mode<synchronous>, transform_indices = @transform_2, window_bounds = array<i64: 1, 8>}, {transform_indices = @transform_3, window_bounds = array<i64: 1, 16, 16, 8>}]} {
    %c0 = arith.constant 0 : index
    %c0_0 = arith.constant 0 : index
    %c0_1 = arith.constant 0 : index
    %c0_2 = arith.constant 0 : index
    %0 = vector.load %arg2[%c0, %c0_0, %c0_1, %c0_2] : memref<1x16x16x8xf32, #tpu.memory_space<vmem>>, vector<1x16x16x8xf32>
    %1 = vector.shape_cast %0 : vector<1x16x16x8xf32> to vector<16x16x8xf32>
    %c0_3 = arith.constant 0 : index
    %c0_4 = arith.constant 0 : index
    %2 = vector.load %arg3[%c0_3, %c0_4] : memref<1x8xf32, #tpu.memory_space<vmem>>, vector<1x8xf32>
    %3 = vector.shape_cast %2 : vector<1x8xf32> to vector<1x1x8xf32>
    %4 = vector.broadcast %3 : vector<1x1x8xf32> to vector<16x16x8xf32>
    %5 = arith.mulf %1, %4 : vector<16x16x8xf32>
    %c0_5 = arith.constant 0 : index
    %c0_6 = arith.constant 0 : index
    %6 = vector.load %arg4[%c0_5, %c0_6] : memref<1x8xf32, #tpu.memory_space<vmem>>, vector<1x8xf32>
    %7 = vector.shape_cast %6 : vector<1x8xf32> to vector<1x1x8xf32>
    %8 = vector.broadcast %7 : vector<1x1x8xf32> to vector<16x16x8xf32>
    %9 = arith.addf %5, %8 : vector<16x16x8xf32>
    %cst = arith.constant 0.000000e+00 : f32
    %10 = vector.broadcast %cst : f32 to vector<16x16x8xf32>
    %11 = arith.maximumf %9, %10 : vector<16x16x8xf32>
    %c0_7 = arith.constant 0 : index
    %c0_8 = arith.constant 0 : index
    %c0_9 = arith.constant 0 : index
    %c0_10 = arith.constant 0 : index
    %12 = vector.load %arg5[%c0_7, %c0_8, %c0_9, %c0_10] : memref<1x16x16x8xf32, #tpu.memory_space<vmem>>, vector<1x16x16x8xf32>
    %13 = vector.shape_cast %12 : vector<1x16x16x8xf32> to vector<16x16x8xf32>
    %14 = vector.shape_cast %11 : vector<16x16x8xf32> to vector<1x16x16x8xf32>
    tpu.vector_store %arg5[%c0_7, %c0_8, %c0_9, %c0_10], %14 {strides = array<i32>} : memref<1x16x16x8xf32, #tpu.memory_space<vmem>>, vector<1x16x16x8xf32>,
    return
  }
  func.func @transform_0(%arg0: i32, %arg1: i32) -> (i32, i32, i32, i32) {
    %c0_i32 = arith.constant 0 : i32
    %c0_i32_0 = arith.constant 0 : i32
    %c0_i32_1 = arith.constant 0 : i32
    return %arg0, %arg1, %c0_i32, %c0_i32_0 : i32, i32, i32, i32
  }
  func.func @transform_1(%arg0: i32, %arg1: i32) -> (i32, i32) {
    %c0_i32 = arith.constant 0 : i32
    %c0_i32_0 = arith.constant 0 : i32
    %c0_i32_1 = arith.constant 0 : i32
    return %c0_i32, %c0_i32_0 : i32, i32
  }
  func.func @transform_2(%arg0: i32, %arg1: i32) -> (i32, i32) {
    %c0_i32 = arith.constant 0 : i32
    %c0_i32_0 = arith.constant 0 : i32
    %c0_i32_1 = arith.constant 0 : i32
    return %c0_i32, %c0_i32_0 : i32, i32
  }
  func.func @transform_3(%arg0: i32, %arg1: i32) -> (i32, i32, i32, i32) {
    %c0_i32 = arith.constant 0 : i32
    %c0_i32_0 = arith.constant 0 : i32
    %c0_i32_1 = arith.constant 0 : i32
    return %arg0, %arg1, %c0_i32, %c0_i32_0 : i32, i32, i32, i32
  }
}

module attributes {stable_mosaic.version = 11 : i64} {
  func.func @conv_kernel(%arg0: i32, %arg1: i32, %arg2: memref<1x18x18x4xbf16, #tpu.memory_space<vmem>>, %arg3: memref<36x128xbf16, #tpu.memory_space<vmem>>, %arg4: memref<1x16x16x8xf32, #tpu.memory_space<vmem>>, %arg5: memref<1x1x1x128xf32, #tpu.memory_space<vmem>>, %arg6: memref<1x1x1x128xf32, #tpu.memory_space<vmem>>, %arg7: memref<256x36xbf16, #tpu.memory_space<vmem>>) attributes {dimension_semantics = [#tpu.dimension_semantics<parallel>, #tpu.dimension_semantics<parallel>], iteration_bounds = array<i64: 2, 1>, scalar_prefetch = 0 : i64, scratch_operands = 1 : i64, tpu.core_type = #tpu.core_type<tc>, window_params = [{transform_indices = @transform_0, window_bounds = array<i64: 1, 18, 18, 4>}, {pipeline_mode = #tpu.pipeline_mode<synchronous>, transform_indices = @transform_1, window_bounds = array<i64: 36, 128>}, {transform_indices = @transform_2, window_bounds = array<i64: 1, 16, 16, 8>}, {transform_indices = @transform_3, window_bounds = array<i64: 1, 1, 1, 128>}, {transform_indices = @transform_4, window_bounds = array<i64: 1, 1, 1, 128>}]} {
    %c16_i32 = arith.constant 16 : i32
    %0 = arith.muli %arg1, %c16_i32 : i32
    %1 = tpu.assume_multiple %0, 8 : i32
    %c0 = arith.constant 0 : index
    %2 = arith.index_cast %1 : i32 to index
    %c0_0 = arith.constant 0 : index
    %c0_1 = arith.constant 0 : index
    %3 = vector.load %arg2[%c0, %2, %c0_0, %c0_1] : memref<1x18x18x4xbf16, #tpu.memory_space<vmem>>, vector<1x18x18x4xbf16>
    %4 = vector.shape_cast %3 : vector<1x18x18x4xbf16> to vector<18x18x4xbf16>
    %5 = vector.extract_strided_slice %4 {offsets = [0, 0, 0], sizes = [16, 16, 4], strides = [1, 1, 1]} : vector<18x18x4xbf16> to vector<16x16x4xbf16>
    %6 = vector.shape_cast %5 : vector<16x16x4xbf16> to vector<256x4xbf16>
    %c0_2 = arith.constant 0 : index
    %c0_3 = arith.constant 0 : index
    %7 = vector.load %arg7[%c0_2, %c0_3] : memref<256x36xbf16, #tpu.memory_space<vmem>>, vector<256x4xbf16>
    tpu.vector_store %arg7[%c0_2, %c0_3], %6 {strides = array<i32>} : memref<256x36xbf16, #tpu.memory_space<vmem>>, vector<256x4xbf16>,
    %8 = vector.extract_strided_slice %4 {offsets = [0, 1, 0], sizes = [16, 16, 4], strides = [1, 1, 1]} : vector<18x18x4xbf16> to vector<16x16x4xbf16>
    %9 = vector.shape_cast %8 : vector<16x16x4xbf16> to vector<256x4xbf16>
    %c0_4 = arith.constant 0 : index
    %c4 = arith.constant 4 : index
    %10 = vector.load %arg7[%c0_4, %c4] : memref<256x36xbf16, #tpu.memory_space<vmem>>, vector<256x4xbf16>
    tpu.vector_store %arg7[%c0_4, %c4], %9 {strides = array<i32>} : memref<256x36xbf16, #tpu.memory_space<vmem>>, vector<256x4xbf16>,
    %11 = vector.extract_strided_slice %4 {offsets = [0, 2, 0], sizes = [16, 16, 4], strides = [1, 1, 1]} : vector<18x18x4xbf16> to vector<16x16x4xbf16>
    %12 = vector.shape_cast %11 : vector<16x16x4xbf16> to vector<256x4xbf16>
    %c0_5 = arith.constant 0 : index
    %c8 = arith.constant 8 : index
    %13 = vector.load %arg7[%c0_5, %c8] : memref<256x36xbf16, #tpu.memory_space<vmem>>, vector<256x4xbf16>
    tpu.vector_store %arg7[%c0_5, %c8], %12 {strides = array<i32>} : memref<256x36xbf16, #tpu.memory_space<vmem>>, vector<256x4xbf16>,
    %14 = vector.extract_strided_slice %4 {offsets = [1, 0, 0], sizes = [16, 16, 4], strides = [1, 1, 1]} : vector<18x18x4xbf16> to vector<16x16x4xbf16>
    %15 = vector.shape_cast %14 : vector<16x16x4xbf16> to vector<256x4xbf16>
    %c0_6 = arith.constant 0 : index
    %c12 = arith.constant 12 : index
    %16 = vector.load %arg7[%c0_6, %c12] : memref<256x36xbf16, #tpu.memory_space<vmem>>, vector<256x4xbf16>
    tpu.vector_store %arg7[%c0_6, %c12], %15 {strides = array<i32>} : memref<256x36xbf16, #tpu.memory_space<vmem>>, vector<256x4xbf16>,
    %17 = vector.extract_strided_slice %4 {offsets = [1, 1, 0], sizes = [16, 16, 4], strides = [1, 1, 1]} : vector<18x18x4xbf16> to vector<16x16x4xbf16>
    %18 = vector.shape_cast %17 : vector<16x16x4xbf16> to vector<256x4xbf16>
    %c0_7 = arith.constant 0 : index
    %c16 = arith.constant 16 : index
    %19 = vector.load %arg7[%c0_7, %c16] : memref<256x36xbf16, #tpu.memory_space<vmem>>, vector<256x4xbf16>
    tpu.vector_store %arg7[%c0_7, %c16], %18 {strides = array<i32>} : memref<256x36xbf16, #tpu.memory_space<vmem>>, vector<256x4xbf16>,
    %20 = vector.extract_strided_slice %4 {offsets = [1, 2, 0], sizes = [16, 16, 4], strides = [1, 1, 1]} : vector<18x18x4xbf16> to vector<16x16x4xbf16>
    %21 = vector.shape_cast %20 : vector<16x16x4xbf16> to vector<256x4xbf16>
    %c0_8 = arith.constant 0 : index
    %c20 = arith.constant 20 : index
    %22 = vector.load %arg7[%c0_8, %c20] : memref<256x36xbf16, #tpu.memory_space<vmem>>, vector<256x4xbf16>
    tpu.vector_store %arg7[%c0_8, %c20], %21 {strides = array<i32>} : memref<256x36xbf16, #tpu.memory_space<vmem>>, vector<256x4xbf16>,
    %23 = vector.extract_strided_slice %4 {offsets = [2, 0, 0], sizes = [16, 16, 4], strides = [1, 1, 1]} : vector<18x18x4xbf16> to vector<16x16x4xbf16>
    %24 = vector.shape_cast %23 : vector<16x16x4xbf16> to vector<256x4xbf16>
    %c0_9 = arith.constant 0 : index
    %c24 = arith.constant 24 : index
    %25 = vector.load %arg7[%c0_9, %c24] : memref<256x36xbf16, #tpu.memory_space<vmem>>, vector<256x4xbf16>
    tpu.vector_store %arg7[%c0_9, %c24], %24 {strides = array<i32>} : memref<256x36xbf16, #tpu.memory_space<vmem>>, vector<256x4xbf16>,
    %26 = vector.extract_strided_slice %4 {offsets = [2, 1, 0], sizes = [16, 16, 4], strides = [1, 1, 1]} : vector<18x18x4xbf16> to vector<16x16x4xbf16>
    %27 = vector.shape_cast %26 : vector<16x16x4xbf16> to vector<256x4xbf16>
    %c0_10 = arith.constant 0 : index
    %c28 = arith.constant 28 : index
    %28 = vector.load %arg7[%c0_10, %c28] : memref<256x36xbf16, #tpu.memory_space<vmem>>, vector<256x4xbf16>
    tpu.vector_store %arg7[%c0_10, %c28], %27 {strides = array<i32>} : memref<256x36xbf16, #tpu.memory_space<vmem>>, vector<256x4xbf16>,
    %29 = vector.extract_strided_slice %4 {offsets = [2, 2, 0], sizes = [16, 16, 4], strides = [1, 1, 1]} : vector<18x18x4xbf16> to vector<16x16x4xbf16>
    %30 = vector.shape_cast %29 : vector<16x16x4xbf16> to vector<256x4xbf16>
    %c0_11 = arith.constant 0 : index
    %c32 = arith.constant 32 : index
    %31 = vector.load %arg7[%c0_11, %c32] : memref<256x36xbf16, #tpu.memory_space<vmem>>, vector<256x4xbf16>
    tpu.vector_store %arg7[%c0_11, %c32], %30 {strides = array<i32>} : memref<256x36xbf16, #tpu.memory_space<vmem>>, vector<256x4xbf16>,
    %c0_12 = arith.constant 0 : index
    %c0_13 = arith.constant 0 : index
    %32 = vector.load %arg7[%c0_12, %c0_13] : memref<256x36xbf16, #tpu.memory_space<vmem>>, vector<256x36xbf16>
    %c0_14 = arith.constant 0 : index
    %c0_15 = arith.constant 0 : index
    %33 = vector.load %arg3[%c0_14, %c0_15] : memref<36x128xbf16, #tpu.memory_space<vmem>>, vector<36x128xbf16>
    %cst = arith.constant dense<0.000000e+00> : vector<256x128xf32>
    %34 = tpu.matmul %32, %33, %cst {dimension_numbers = #tpu.dot_dimension_numbers<[1], [0], [0], [1], [0, 0, 1, 1], [], []>} : vector<256x36xbf16>, vector<36x128xbf16>, vector<256x128xf32> -> vector<256x128xf32>
    %35 = vector.shape_cast %34 : vector<256x128xf32> to vector<16x16x128xf32>
    %36 = vector.extract_strided_slice %35 {offsets = [0, 0, 0], sizes = [16, 16, 8], strides = [1, 1, 1]} : vector<16x16x128xf32> to vector<16x16x8xf32>
    %c0_16 = arith.constant 0 : index
    %c0_17 = arith.constant 0 : index
    %c0_18 = arith.constant 0 : index
    %c0_19 = arith.constant 0 : index
    %37 = vector.load %arg4[%c0_16, %c0_17, %c0_18, %c0_19] : memref<1x16x16x8xf32, #tpu.memory_space<vmem>>, vector<1x16x16x8xf32>
    %38 = vector.shape_cast %37 : vector<1x16x16x8xf32> to vector<16x16x8xf32>
    %39 = vector.shape_cast %36 : vector<16x16x8xf32> to vector<1x16x16x8xf32>
    tpu.vector_store %arg4[%c0_16, %c0_17, %c0_18, %c0_19], %39 {strides = array<i32>} : memref<1x16x16x8xf32, #tpu.memory_space<vmem>>, vector<1x16x16x8xf32>,
    %cst_20 = arith.constant dense<0.000000e+00> : vector<128xf32>
    %40 = vector.multi_reduction <add>, %34, %cst_20 [0] : vector<256x128xf32> to vector<128xf32>
    %41 = vector.shape_cast %40 : vector<128xf32> to vector<1x128xf32>
    %c0_21 = arith.constant 0 : index
    %c0_22 = arith.constant 0 : index
    %c0_23 = arith.constant 0 : index
    %c0_24 = arith.constant 0 : index
    %42 = vector.load %arg5[%c0_21, %c0_22, %c0_23, %c0_24] : memref<1x1x1x128xf32, #tpu.memory_space<vmem>>, vector<1x1x1x128xf32>
    %43 = vector.shape_cast %42 : vector<1x1x1x128xf32> to vector<1x128xf32>
    %44 = vector.shape_cast %41 : vector<1x128xf32> to vector<1x1x1x128xf32>
    tpu.vector_store %arg5[%c0_21, %c0_22, %c0_23, %c0_24], %44 {strides = array<i32>} : memref<1x1x1x128xf32, #tpu.memory_space<vmem>>, vector<1x1x1x128xf32>,
    %45 = arith.mulf %34, %34 : vector<256x128xf32>
    %cst_25 = arith.constant dense<0.000000e+00> : vector<128xf32>
    %46 = vector.multi_reduction <add>, %45, %cst_25 [0] : vector<256x128xf32> to vector<128xf32>
    %47 = vector.shape_cast %46 : vector<128xf32> to vector<1x128xf32>
    %c0_26 = arith.constant 0 : index
    %c0_27 = arith.constant 0 : index
    %c0_28 = arith.constant 0 : index
    %c0_29 = arith.constant 0 : index
    %48 = vector.load %arg6[%c0_26, %c0_27, %c0_28, %c0_29] : memref<1x1x1x128xf32, #tpu.memory_space<vmem>>, vector<1x1x1x128xf32>
    %49 = vector.shape_cast %48 : vector<1x1x1x128xf32> to vector<1x128xf32>
    %50 = vector.shape_cast %47 : vector<1x128xf32> to vector<1x1x1x128xf32>
    tpu.vector_store %arg6[%c0_26, %c0_27, %c0_28, %c0_29], %50 {strides = array<i32>} : memref<1x1x1x128xf32, #tpu.memory_space<vmem>>, vector<1x1x1x128xf32>,
    return
  }
  func.func @transform_0(%arg0: i32, %arg1: i32) -> (i32, i32, i32, i32) {
    %c0_i32 = arith.constant 0 : i32
    %c0_i32_0 = arith.constant 0 : i32
    %c0_i32_1 = arith.constant 0 : i32
    %c0_i32_2 = arith.constant 0 : i32
    return %arg0, %c0_i32, %c0_i32_0, %c0_i32_1 : i32, i32, i32, i32
  }
  func.func @transform_1(%arg0: i32, %arg1: i32) -> (i32, i32) {
    %c0_i32 = arith.constant 0 : i32
    %c0_i32_0 = arith.constant 0 : i32
    %c0_i32_1 = arith.constant 0 : i32
    return %c0_i32, %c0_i32_0 : i32, i32
  }
  func.func @transform_2(%arg0: i32, %arg1: i32) -> (i32, i32, i32, i32) {
    %c0_i32 = arith.constant 0 : i32
    %c0_i32_0 = arith.constant 0 : i32
    %c0_i32_1 = arith.constant 0 : i32
    return %arg0, %arg1, %c0_i32, %c0_i32_0 : i32, i32, i32, i32
  }
  func.func @transform_3(%arg0: i32, %arg1: i32) -> (i32, i32, i32, i32) {
    %c0_i32 = arith.constant 0 : i32
    %c0_i32_0 = arith.constant 0 : i32
    %c0_i32_1 = arith.constant 0 : i32
    return %arg0, %arg1, %c0_i32, %c0_i32_0 : i32, i32, i32, i32
  }
  func.func @transform_4(%arg0: i32, %arg1: i32) -> (i32, i32, i32, i32) {
    %c0_i32 = arith.constant 0 : i32
    %c0_i32_0 = arith.constant 0 : i32
    %c0_i32_1 = arith.constant 0 : i32
    return %arg0, %arg1, %c0_i32, %c0_i32_0 : i32, i32, i32, i32
  }
}

</mosaic_0001>

<bundles_post_ra>
// kernel: conv_block_forward.3
= control target key start
LH: loop header
LB: loop body
LE: loop exit
PB: predicated region body
PF: predicated region fallthrough
CT: control target
= control target key end

     0   :  { %s569_s12 = smov 0   ;;  %s571_s13 = smov 0   ;;  %s807_s0 = inlined_call_operand.vmem [shape: f32[2,16,16,8], index: 0, kind: input, shape index: {}, may-alias: {0,3}]   ;;  %s808_s1 = inlined_call_operand.vmem [shape: f32[1,8], index: 1, kind: input, shape index: {}]   ;;  %s809_s2 = inlined_call_operand.vmem [shape: f32[1,8], index: 2, kind: input, shape index: {}]   ;;  %s810_s3 = inlined_call_operand.vmem [shape: f32[2,16,16,8], index: 3, kind: output, shape index: {}, may-alias: {0,3}]  }
   0x1   :  { %s573_s14 = smov 0  }
   0x2 LB: > { %s25_s15 = sadd.s32 1, %s543_s13  ;;  %p490_p0 = scmp.ge.s32.totalorder %s547_s14, 1  ;;  %s547_s14 = sphi %s573_s14, %s13_s14   ;;  %s543_s13 = sphi %s571_s13, %s812_s13   ;;  %s539_s12 = sphi %s569_s12, %s811_s12  }
   0x3   : > { %p27_p1 = scmp.ge.s32.totalorder %s25_s15, 2  ;;  %p159_p2 = scmp.lt.s32.totalorder %s547_s14, 3 }
   0x5   : > { %s814_s15 = smov (%p27_p1, %s25_s15), 0  ;;  %p160_p3 = pnand %p490_p0, %p159_p2 }
   0x6   : > { %p194_p4 = scmp.lt.s32.totalorder (!%p160_p3), %s539_s12, 1  ;;  %v593_v0 = vld [vmem:[%s808_s1] ss:$0 sm:$0xff] (!%p160_p3)  ;;  %vm357_vm0 = vcmask (!%p160_p3), 64512  }
   0x7   : > { %163 = sbr.rel (%p160_p3) target bundleno = 47 (0x2f), region = 32  ;;  %v605_v1 = vld [vmem:[%s809_s2] ss:$0 sm:$0xff] (!%p160_p3) }
   0xe   : > { %s816_s12 = smov (!%p194_p4, %s539_s12), 1 }
   0xf   : > { %s499_s16 = sshll.u32 %s816_s12, 8 }
  0x10   : > { %s600_s21 = scalar_lea.vmem %s807_s0, %s499_s16  ;;  %s647_s26 = scalar_lea.vmem %s810_s3, %s499_s16 }
  0x11   : > { %v215_v2 = vld [vmem:[%s600_s21] sm:$0xff]  ;;  %v216_v3 = vld [vmem:[%s600_s21 + $0x8] sm:$0xff]  ;;  %v217_v4 = vld [vmem:[%s600_s21 + $0x10] sm:$0xff] }
  0x12   : > { %v218_v5 = vld [vmem:[%s600_s21 + $0x18] sm:$0xff]  ;;  %v219_v6 = vld [vmem:[%s600_s21 + $0x20] sm:$0xff]  ;;  %v220_v7 = vld [vmem:[%s600_s21 + $0x28] sm:$0xff]  ;;  %v254_v8 = vmul.f32 %v593_v0, %v215_v2  ;;  %v255_v9 = vmul.f32 %v593_v0, %v216_v3  ;;  %v256_v10 = vmul.f32 %v593_v0, %v217_v4 }
  0x13   : > { %v221_v11 = vld [vmem:[%s600_s21 + $0x30] sm:$0xff]  ;;  %v222_v12 = vld [vmem:[%s600_s21 + $0x38] sm:$0xff]  ;;  %v257_v13 = vmul.f32 %v593_v0, %v218_v5  ;;  %v258_v14 = vmul.f32 %v593_v0, %v219_v6  ;;  %v259_v15 = vmul.f32 %v593_v0, %v220_v7  ;;  %v223_v20 = vld [vmem:[%s600_s21 + $0x40] sm:$0xff] }
  0x14   : > { %v293_v16 = vadd.f32 %v605_v1, %v254_v8  ;;  %v294_v17 = vadd.f32 %v605_v1, %v255_v9  ;;  %v295_v18 = vadd.f32 %v605_v1, %v256_v10  ;;  %v260_v19 = vmul.f32 %v593_v0, %v221_v11  ;;  %v224_v21 = vld [vmem:[%s600_s21 + $0x48] sm:$0xff]  ;;  %v225_v22 = vld [vmem:[%s600_s21 + $0x50] sm:$0xff]  ;;  %v226_v27 = vld [vmem:[%s600_s21 + $0x58] sm:$0xff] }
  0x15   : > { %v296_v23 = vadd.f32 %v605_v1, %v257_v13  ;;  %v297_v24 = vadd.f32 %v605_v1, %v258_v14  ;;  %v298_v25 = vadd.f32 %v605_v1, %v259_v15  ;;  %v261_v26 = vmul.f32 %v593_v0, %v222_v12  ;;  %v227_v28 = vld [vmem:[%s600_s21 + $0x60] sm:$0xff]  ;;  %v228_v29 = vld [vmem:[%s600_s21 + $0x68] sm:$0xff]  ;;  %v229_v34 = vld [vmem:[%s600_s21 + $0x70] sm:$0xff] }
  0x16   : > { %v325_v30 = vmax.f32 %v293_v16, 0.0  ;;  %v326_v31 = vmax.f32 %v294_v17, 0.0  ;;  %v327_v32 = vmax.f32 %v295_v18, 0.0  ;;  %v299_v33 = vadd.f32 %v605_v1, %v260_v19  ;;  %v230_v39 = vld [vmem:[%s600_s21 + $0x78] sm:$0xff]  ;;  %v231_v44 = vld [vmem:[%s600_s21 + $0x80] sm:$0xff]  ;;  %v232_v45 = vld [vmem:[%s600_s21 + $0x88] sm:$0xff] }
  0x17   : > { %v328_v35 = vmax.f32 %v296_v23, 0.0  ;;  %v329_v36 = vmax.f32 %v297_v24, 0.0  ;;  %v330_v37 = vmax.f32 %v298_v25, 0.0  ;;  %v300_v38 = vadd.f32 %v605_v1, %v261_v26  ;;  %v233_v46 = vld [vmem:[%s600_s21 + $0x90] sm:$0xff]  ;;  %v234_v47 = vld [vmem:[%s600_s21 + $0x98] sm:$0xff]  ;;  %v235_v48 = vld [vmem:[%s600_s21 + $0xa0] sm:$0xff] }
  0x18   : > { %v331_v40 = vmax.f32 %v299_v33, 0.0  ;;  %v262_v41 = vmul.f32 %v593_v0, %v223_v20  ;;  %v263_v42 = vmul.f32 %v593_v0, %v224_v21  ;;  %v264_v43 = vmul.f32 %v593_v0, %v225_v22  ;;  %v236_v49 = vld [vmem:[%s600_s21 + $0xa8] sm:$0xff]  ;;  %v237_v50 = vld [vmem:[%s600_s21 + $0xb0] sm:$0xff]  ;;  %v238_v51 = vld [vmem:[%s600_s21 + $0xb8] sm:$0xff] }
  0x19   : > { %v658_v52 = vld [vmem:[%s600_s21 + $0xc0] sm:$0xff]  ;;  %v661_v53 = vld [vmem:[%s600_s21 + $0xc8] sm:$0xff]  ;;  %v332_v54 = vmax.f32 %v300_v38, 0.0  ;;  %v265_v55 = vmul.f32 %v593_v0, %v226_v27  ;;  %v266_v56 = vmul.f32 %v593_v0, %v227_v28  ;;  %v267_v57 = vmul.f32 %v593_v0, %v228_v29  ;;  %v667_v58 = vld [vmem:[%s600_s21 + $0xd0] sm:$0xff] }
  0x1a   : > { %v670_v59 = vld [vmem:[%s600_s21 + $0xd8] sm:$0xff]  ;;  %v673_v60 = vld [vmem:[%s600_s21 + $0xe0] sm:$0xff]  ;;  %v301_v61 = vadd.f32 %v605_v1, %v262_v41  ;;  %v302_v62 = vadd.f32 %v605_v1, %v263_v42  ;;  %v303_v63 = vadd.f32 %v605_v1, %v264_v43  ;;  %v268_v2 = vmul.f32 %v593_v0, %v229_v34  ;;  %v680_v3 = vld [vmem:[%s600_s21 + $0xe8] sm:$0xff] }
  0x1b   : > { %v683_v4 = vld [vmem:[%s600_s21 + $0xf0] sm:$0xff]  ;;  %v686_v5 = vld [vmem:[%s600_s21 + $0xf8] sm:$0xff]  ;;  %v304_v6 = vadd.f32 %v605_v1, %v265_v55  ;;  %v305_v7 = vadd.f32 %v605_v1, %v266_v56  ;;  %v306_v8 = vadd.f32 %v605_v1, %v267_v57  ;;  %v269_v9 = vmul.f32 %v593_v0, %v230_v39 }
  0x1c   : > { %358 = vst.msk [vmem:[%s647_s26] sm:$0xff] %vm357_vm0, %v325_v30  ;;  %359 = vst.msk [vmem:[%s647_s26 + $0x8] sm:$0xff] %vm357_vm0, %v326_v31  ;;  %v333_v10 = vmax.f32 %v301_v61, 0.0  ;;  %v334_v11 = vmax.f32 %v302_v62, 0.0  ;;  %v335_v12 = vmax.f32 %v303_v63, 0.0  ;;  %v307_v13 = vadd.f32 %v605_v1, %v268_v2 }
  0x1d   : > { %360 = vst.msk [vmem:[%s647_s26 + $0x10] sm:$0xff] %vm357_vm0, %v327_v32  ;;  %361 = vst.msk [vmem:[%s647_s26 + $0x18] sm:$0xff] %vm357_vm0, %v328_v35  ;;  %v336_v14 = vmax.f32 %v304_v6, 0.0  ;;  %v337_v15 = vmax.f32 %v305_v7, 0.0  ;;  %v338_v16 = vmax.f32 %v306_v8, 0.0  ;;  %v308_v17 = vadd.f32 %v605_v1, %v269_v9 }
  0x1e   : > { %362 = vst.msk [vmem:[%s647_s26 + $0x20] sm:$0xff] %vm357_vm0, %v329_v36  ;;  %363 = vst.msk [vmem:[%s647_s26 + $0x28] sm:$0xff] %vm357_vm0, %v330_v37  ;;  %v339_v18 = vmax.f32 %v307_v13, 0.0  ;;  %v270_v19 = vmul.f32 %v593_v0, %v231_v44  ;;  %v271_v20 = vmul.f32 %v593_v0, %v232_v45  ;;  %v272_v21 = vmul.f32 %v593_v0, %v233_v46 }
  0x1f   : > { %364 = vst.msk [vmem:[%s647_s26 + $0x30] sm:$0xff] %vm357_vm0, %v331_v40  ;;  %365 = vst.msk [vmem:[%s647_s26 + $0x38] sm:$0xff] %vm357_vm0, %v332_v54  ;;  %v340_v22 = vmax.f32 %v308_v17, 0.0  ;;  %v273_v23 = vmul.f32 %v593_v0, %v234_v47  ;;  %v274_v24 = vmul.f32 %v593_v0, %v235_v48  ;;  %v275_v25 = vmul.f32 %v593_v0, %v236_v49 }
  0x20   : > { %366 = vst.msk [vmem:[%s647_s26 + $0x40] sm:$0xff] %vm357_vm0, %v333_v10  ;;  %367 = vst.msk [vmem:[%s647_s26 + $0x48] sm:$0xff] %vm357_vm0, %v334_v11  ;;  %v309_v26 = vadd.f32 %v605_v1, %v270_v19  ;;  %v310_v27 = vadd.f32 %v605_v1, %v271_v20  ;;  %v311_v28 = vadd.f32 %v605_v1, %v272_v21 }
  0x21   : > { %368 = vst.msk [vmem:[%s647_s26 + $0x50] sm:$0xff] %vm357_vm0, %v335_v12  ;;  %369 = vst.msk [vmem:[%s647_s26 + $0x58] sm:$0xff] %vm357_vm0, %v336_v14  ;;  %v276_v29 = vmul.f32 %v593_v0, %v237_v50  ;;  %v312_v30 = vadd.f32 %v605_v1, %v273_v23  ;;  %v313_v31 = vadd.f32 %v605_v1, %v274_v24 }
  0x22   : > { %370 = vst.msk [vmem:[%s647_s26 + $0x60] sm:$0xff] %vm357_vm0, %v337_v15  ;;  %371 = vst.msk [vmem:[%s647_s26 + $0x68] sm:$0xff] %vm357_vm0, %v338_v16  ;;  %v314_v32 = vadd.f32 %v605_v1, %v275_v25  ;;  %v277_v33 = vmul.f32 %v593_v0, %v238_v51  ;;  %v341_v34 = vmax.f32 %v309_v26, 0.0  ;;  %v342_v35 = vmax.f32 %v310_v27, 0.0 }
  0x23   : > { %372 = vst.msk [vmem:[%s647_s26 + $0x70] sm:$0xff] %vm357_vm0, %v339_v18  ;;  %373 = vst.msk [vmem:[%s647_s26 + $0x78] sm:$0xff] %vm357_vm0, %v340_v22  ;;  %v343_v36 = vmax.f32 %v311_v28, 0.0  ;;  %v315_v37 = vadd.f32 %v605_v1, %v276_v29  ;;  %v344_v38 = vmax.f32 %v312_v30, 0.0  ;;  %v345_v39 = vmax.f32 %v313_v31, 0.0 }
  0x24   : > { %v346_v40 = vmax.f32 %v314_v32, 0.0  ;;  %v316_v41 = vadd.f32 %v605_v1, %v277_v33  ;;  %374 = vst.msk [vmem:[%s647_s26 + $0x80] sm:$0xff] %vm357_vm0, %v341_v34  ;;  %375 = vst.msk [vmem:[%s647_s26 + $0x88] sm:$0xff] %vm357_vm0, %v342_v35  ;;  %v278_v43 = vmul.f32 %v593_v0, %v658_v52  ;;  %v279_v44 = vmul.f32 %v593_v0, %v661_v53 }
  0x25   : > { %376 = vst.msk [vmem:[%s647_s26 + $0x90] sm:$0xff] %vm357_vm0, %v343_v36  ;;  %v347_v42 = vmax.f32 %v315_v37, 0.0  ;;  %v280_v45 = vmul.f32 %v593_v0, %v667_v58  ;;  %377 = vst.msk [vmem:[%s647_s26 + $0x98] sm:$0xff] %vm357_vm0, %v344_v38  ;;  %v281_v47 = vmul.f32 %v593_v0, %v670_v59  ;;  %v282_v48 = vmul.f32 %v593_v0, %v673_v60 }
  0x26   : > { %378 = vst.msk [vmem:[%s647_s26 + $0xa0] sm:$0xff] %vm357_vm0, %v345_v39  ;;  %379 = vst.msk [vmem:[%s647_s26 + $0xa8] sm:$0xff] %vm357_vm0, %v346_v40  ;;  %v348_v46 = vmax.f32 %v316_v41, 0.0  ;;  %v283_v49 = vmul.f32 %v593_v0, %v680_v3  ;;  %v317_v50 = vadd.f32 %v605_v1, %v278_v43  ;;  %v318_v51 = vadd.f32 %v605_v1, %v279_v44 }
  0x27   : > { %380 = vst.msk [vmem:[%s647_s26 + $0xb0] sm:$0xff] %vm357_vm0, %v347_v42  ;;  %v319_v52 = vadd.f32 %v605_v1, %v280_v45  ;;  %v284_v53 = vmul.f32 %v593_v0, %v683_v4  ;;  %v320_v54 = vadd.f32 %v605_v1, %v281_v47  ;;  %v321_v55 = vadd.f32 %v605_v1, %v282_v48 }
  0x28   : > { %381 = vst.msk [vmem:[%s647_s26 + $0xb8] sm:$0xff] %vm357_vm0, %v348_v46  ;;  %v322_v56 = vadd.f32 %v605_v1, %v283_v49  ;;  %v285_v57 = vmul.f32 %v593_v0, %v686_v5  ;;  %v349_v58 = vmax.f32 %v317_v50, 0.0  ;;  %v350_v59 = vmax.f32 %v318_v51, 0.0 }
  0x29   : > { %v351_v60 = vmax.f32 %v319_v52, 0.0  ;;  %v323_v61 = vadd.f32 %v605_v1, %v284_v53  ;;  %v352_v62 = vmax.f32 %v320_v54, 0.0  ;;  %v353_v63 = vmax.f32 %v321_v55, 0.0 }
  0x2a   : > { %v354_v2 = vmax.f32 %v322_v56, 0.0  ;;  %v324_v3 = vadd.f32 %v605_v1, %v285_v57  ;;  %382 = vst.msk [vmem:[%s647_s26 + $0xc0] sm:$0xff] %vm357_vm0, %v349_v58  ;;  %383 = vst.msk [vmem:[%s647_s26 + $0xc8] sm:$0xff] %vm357_vm0, %v350_v59 }
  0x2b   : > { %384 = vst.msk [vmem:[%s647_s26 + $0xd0] sm:$0xff] %vm357_vm0, %v351_v60  ;;  %v355_v4 = vmax.f32 %v323_v61, 0.0  ;;  %385 = vst.msk [vmem:[%s647_s26 + $0xd8] sm:$0xff] %vm357_vm0, %v352_v62 }
  0x2c   : > { %386 = vst.msk [vmem:[%s647_s26 + $0xe0] sm:$0xff] %vm357_vm0, %v353_v63  ;;  %387 = vst.msk [vmem:[%s647_s26 + $0xe8] sm:$0xff] %vm357_vm0, %v354_v2  ;;  %v356_v0 = vmax.f32 %v324_v3, 0.0 }
  0x2d   : > { %388 = vst.msk [vmem:[%s647_s26 + $0xf0] sm:$0xff] %vm357_vm0, %v355_v4 }
  0x2e   : > { %389 = vst.msk [vmem:[%s647_s26 + $0xf8] sm:$0xff] %vm357_vm0, %v356_v0 }
  0x2f PF: > { %s13_s14 = sadd.s32 1, %s547_s14   ;;  %s811_s12 = smov %s543_s13 }
  0x30   : > { %p10_p5 = scmp.ge.s32.totalorder %s13_s14, 4   ;;  %s812_s13 = smov %s814_s15 }
  0x32   :  { %12 = sbr.rel (!%p10_p5) target bundleno = 2 (0x2), region = 62 }

// kernel: conv_block_forward.2
= control target key start
LH: loop header
LB: loop body
LE: loop exit
PB: predicated region body
PF: predicated region fallthrough
CT: control target
= control target key end

     0   :  { %s2475_s15 = smov 0   ;;  %s2477_s16 = smov 0   ;;  %s3478_s0 = inlined_call_operand.vmem [shape: bf16[2,18,18,4], index: 0, kind: input, shape index: {}]   ;;  %s3479_s1 = inlined_call_operand.vmem [shape: bf16[36,128], index: 1, kind: input, shape index: {}]   ;;  %s3480_s2 = inlined_call_operand.vmem [shape: f32[2,16,16,8], index: 2, kind: output, shape index: {0}]   ;;  %s3481_s3 = inlined_call_operand.vmem [shape: f32[2,1,1,128], index: 3, kind: output, shape index: {1}]   ;;  %s3482_s4 = inlined_call_operand.vmem [shape: f32[2,1,1,128], index: 4, kind: output, shape index: {2}]  }
   0x1   :  { %s2479_s17 = smov 0  }
   0x2 LB: > { %s27_s18 = sadd.s32 1, %s2436_s16  ;;  %p2202_p0 = scmp.ge.s32.totalorder %s2440_s17, 1  ;;  %s2440_s17 = sphi %s2479_s17, %s15_s17   ;;  %s2436_s16 = sphi %s2477_s16, %s3488_s16   ;;  %s2432_s15 = sphi %s2475_s15, %s3487_s15  }
   0x3   : > { %p29_p1 = scmp.ge.s32.totalorder %s27_s18, 2  ;;  %p185_p2 = scmp.lt.s32.totalorder %s2440_s17, 3 }
   0x5   : > { %s3490_s18 = smov (%p29_p1, %s27_s18), 0  ;;  %p186_p3 = pnand %p2202_p0, %p185_p2 }
   0x6   : > { %p228_p4 = scmp.lt.s32.totalorder (!%p186_p3), %s2432_s15, 1  ;;  %vm411_vm0 = vcmask (!%p186_p3), 31744   ;;  %vm944_vm1 = vcmask (!%p186_p3), 1042432   ;;  %vm945_vm2 = vcmask (!%p186_p3), 1046532   ;;  %vm428_vm3 = vsmask.f32 (!%p186_p3), 3328 }
   0x7   : > { %189 = sbr.rel (%p186_p3) target bundleno = 641 (0x281), region = 28  ;;  %vm429_vm4 = vsmask.f32 (!%p186_p3), 7440  ;;  %vm2519_vm5 = vmor (!%p186_p3), %vm944_vm1, %vm945_vm2  ;;  %s2442_s23 = smov (!%p186_p3), 12   ;;  %vm1733_vm7 = vcmask (!%p186_p3), 1041408   ;;  %vm911_vm8 = vcmask (!%p186_p3), 64544  }
   0x8   : > { %s2443_s24 = smov (!%p186_p3), 20   ;;  %vm2556_vm6 = vmor (!%p186_p3), %vm428_vm3, %vm429_vm4  ;;  %s2444_s25 = smov (!%p186_p3), 8   ;;  %vm1155_vm9 = vcmask (!%p186_p3), 97344   ;;  %vm1225_vm10 = vcmask (!%p186_p3), 130144   ;;  %vm1317_vm11 = vcmask (!%p186_p3), 162944   ;;  %vm1393_vm12 = vcmask (!%p186_p3), 195744  }
   0x9   : > { %s2445_s26 = smov (!%p186_p3), 4   ;;  %s2446_s29 = smov (!%p186_p3), 16   ;;  %vm1463_vm13 = vcmask (!%p186_p3), 228544   ;;  %vm1555_vm14 = vcmask (!%p186_p3), 261344   ;;  %vm1631_vm15 = vcmask (!%p186_p3), 294144   ;;  %vm1898_vm1 = vcmask (!%p186_p3), 64512  }
   0xa   : > { %s2447_s6 = smov (!%p186_p3), 24   ;;  %s2448_s7 = smov (!%p186_p3), 28  }
   0xb   : > { %s2449_s8 = smov (!%p186_p3), 32  }
   0xe   : > { %s3492_s15 = smov (!%p228_p4, %s2432_s15), 1 }
   0xf   : > { %s2365_s19 = smul.u32 216, %s3492_s15  ;;  %s2299_s11 = sshll.u32 %s3492_s15, 8 }
  0x10   : > { %s3391_s14 = scalar_lea.vmem %s3480_s2, %s2299_s11  ;;  %s249_s21 = scalar_lea.vmem %s3481_s3, %s3492_s15 }
  0x11   : > { %s2499_s22 = scalar_lea.vmem %s3478_s0, %s2365_s19 }
  0x12   : > { %v2502_v0 = vld [vmem:[%s2499_s22 + $0x18] sm:$0xf]  ;;  %v2505_v1 = vld [vmem:[%s2499_s22 + $0x1c] sm:$0xf]  ;;  %v264_v2 = vld [vmem:[%s2499_s22 + $0xc] sm:$0xf] }
  0x13   : > { %v2510_v3 = vcombine.low %v2502_v0, %v2505_v1  ;;  %v480_v4 = vshrl.u32 %v2502_v0, 16  ;;  %v483_v5 = vshll.u32 %v2502_v0, 16  ;;  %v493_v6 = vshrl.u32 %v2505_v1, 16  ;;  %v265_v7 = vld [vmem:[%s2499_s22 + $0x10] sm:$0xf] }
  0x14   : > { %v2207_v8 = vcombine.low %v264_v2, %v265_v7  ;;  %v456_v9 = vshrl.u32 %v264_v2, 16  ;;  %v459_v10 = vshll.u32 %v264_v2, 16  ;;  %v465_v11 = vshll.u32 %v265_v7, 16  ;;  %v266_v12 = vld [vmem:[%s2499_s22 + $0x14] sm:$0x1] }
  0x15   : > { %1179 = vrot.lane.b32.xlu1 %v2510_v3, %s2442_s23  ;;  %v469_v14 = vshrl.u32 %v265_v7, 16  ;;  %414 = vst.msk [vmem:[#allocation2 + $0x10] sm:$0xff] %vm411_vm0, %v2510_v3  ;;  %v2239_v15 = vrot.slane %v264_v2, 9  ;;  %v956_v16 = vrot.slane %v265_v7, 5  ;;  %v959_v17 = vrot.slane %v266_v12, 5 }
  0x16   : > { %v2528_v18 = vld [vmem:[%s2499_s22] sm:$0xf]  ;;  %v458_v19 = vrot.slane %v456_v9, 4  ;;  %v461_v20 = vrot.slane %v459_v10, 5  ;;  %1177 = vrot.lane.b32.xlu0 %v2207_v8, %s2442_s23  ;;  %413 = vst.msk [vmem:[#allocation2 + $0x8] sm:$0xff] %vm411_vm0, %v2207_v8  ;;  %v2240_v45 = vrot.slane %v2502_v0, 9 }
  0x17   : > { %v2533_v21 = vld [vmem:[%s2499_s22 + $0x4] sm:$0xf]  ;;  %v263_v22 = vld [vmem:[%s2499_s22 + $0x8] sm:$0x1]  ;;  %v471_v23 = vrot.slane %v469_v14, 4  ;;  %v957_v24 = vsel %vm2519_vm5, %v2239_v15, %v956_v16  ;;  %v958_v25 = vrot.slane %v956_v16, 4 }
  0x18   : > { %v2238_v26 = vrot.slane %v2528_v18, 9  ;;  %v949_v27 = vrot.slane %v2533_v21, 5  ;;  %v952_v28 = vrot.slane %v263_v22, 5  ;;  %v432_v29 = vshrl.u32 %v2528_v18, 16  ;;  %v269_v35 = vld [vmem:[%s2499_s22 + $0x20] sm:$0x1] }
  0x19   : > { %v435_v30 = vshll.u32 %v2528_v18, 16  ;;  %v960_v31 = vsel %vm2519_vm5, %v958_v25, %v959_v17  ;;  %v441_v32 = vshll.u32 %v2533_v21, 16  ;;  %v445_v33 = vshrl.u32 %v2533_v21, 16  ;;  %v2570_v7 = vld [vmem:[%s2499_s22 + $0x24] sm:$0xf] }
  0x1a   : > { %v451_v34 = vshll.u32 %v263_v22, 16  ;;  %v2255_v36 = vcombine.low %v957_v24, %v960_v31  ;;  %v950_v37 = vsel %vm2519_vm5, %v2238_v26, %v949_v27  ;;  %v951_v38 = vrot.slane %v949_v27, 4  ;;  %v272_v25 = vld [vmem:[%s2499_s22 + $0x2c] sm:$0x1] }
  0x1b   : > { %v434_v39 = vrot.slane %v432_v29, 4  ;;  %v437_v40 = vrot.slane %v435_v30, 5  ;;  %v443_v41 = vrot.slane %v441_v32, 5  ;;  %v447_v42 = vrot.slane %v445_v33, 4 }
  0x1c   : > { %v453_v43 = vrot.slane %v451_v34, 5  ;;  %1345 = vrot.lane.b32.xlu0 %v2255_v36, %s2443_s24  ;;  %v953_v44 = vsel %vm2519_vm5, %v951_v38, %v952_v28  ;;  %v963_v46 = vrot.slane %v2505_v1, 5  ;;  %v966_v47 = vrot.slane %v269_v35, 5  ;;  %v2602_v38 = vld [vmem:[%s2499_s22 + $0x30] sm:$0xf] }
  0x1d   : > { %v2254_v48 = vcombine.low %v950_v37, %v953_v44  ;;  %v438_v49 = vor.u32 %v437_v40, %v434_v39  ;;  %v448_v50 = vor.u32 %v447_v42, %v443_v41  ;;  %v462_v51 = vor.u32 %v461_v20, %v458_v19  ;;  %v2605_v39 = vld [vmem:[%s2499_s22 + $0x34] sm:$0xf] }
  0x1e   : > { %v964_v53 = vsel %vm2519_vm5, %v2240_v45, %v963_v46  ;;  %v965_v54 = vrot.slane %v963_v46, 4  ;;  %v467_v55 = vrot.slane %v465_v11, 5  ;;  %v475_v56 = vshll.u32 %v266_v12, 16  ;;  %v2408_v45 = vld [vmem:[%s3479_s1] sm:$0xff]  }
  0x1f   : > { %1107 = vrot.lane.b32.xlu1 %v2254_v48, %s2444_s25  ;;  %v439_v57 = vrot.slane %v438_v49, 4  ;;  %v449_v58 = vrot.slane %v448_v50, 4  ;;  %v463_v59 = vrot.slane %v462_v51, 4  ;;  %v482_v60 = vrot.slane %v480_v4, 4  ;;  %2319 = vmatprep.subr.bf16.mxu0 %v2408_v45 }
  0x20   : > { %v967_v61 = vsel %vm2519_vm5, %v965_v54, %v966_v47  ;;  %v472_v62 = vor.u32 %v471_v23, %v467_v55  ;;  %v477_v63 = vrot.slane %v475_v56, 5  ;;  %v485_v2 = vrot.slane %v483_v5, 5  ;;  %v271_v5 = vld [vmem:[%s2499_s22 + $0x28] sm:$0xf]  ;;  %v2627_v54 = vld [vmem:[%s2499_s22 + $0x38] sm:$0x1]  ;;  %2320 = vmatpush3.bf16.msra.mxu0 %v2408_v45  ;;  %2357 = vmatprep.subr.bf16.mxu1 %v2408_v45 }
  0x21   : > { %v444_v8 = vsel %vm2556_vm6, %v439_v57, %v443_v41  ;;  %v454_v9 = vsel %vm2556_vm6, %v449_v58, %v453_v43  ;;  %v2576_v10 = vcombine.low %v964_v53, %v967_v61  ;;  %v468_v4 = vsel %vm2556_vm6, %v463_v59, %v467_v55  ;;  %v2630_v55 = vld [vmem:[%s2499_s22 + $0x3c] sm:$0xf]  ;;  %v2409_v61 = vld [vmem:[%s3479_s1 + $0x8] sm:$0xff]   ;;  %2360 = vmatpush3.bf16.msra.mxu1 %v2408_v45 }
  0x22   : > { %v2222_v11 = vcombine.low %v444_v8, %v454_v9  ;;  %v473_v12 = vrot.slane %v472_v62, 4  ;;  %v486_v14 = vor.u32 %v485_v2, %v482_v60  ;;  %v489_v0 = vshll.u32 %v2505_v1, 16  ;;  %v2639_v60 = vld [vmem:[%s2499_s22 + $0x40] sm:$0xf]  ;;  %2321 = vmatprep.subr.bf16.mxu0 %v2409_v61  ;;  %2358 = vmatprep.subr.bf16.mxu1 %v2409_v61 }
  0x23   : > { %1109 = vrot.lane.b32.xlu1 %v2255_v36, %s2444_s25  ;;  %v495_v15 = vrot.slane %v493_v6, 4  ;;  %v499_v16 = vshll.u32 %v269_v35, 16  ;;  %v2586_v17 = vcombine.low %v2570_v7, %v271_v5  ;;  %v504_v19 = vshrl.u32 %v2570_v7, 16 }
  0x24   : > { %863 = vrot.lane.b32.xlu0 %v2222_v11, %s2445_s26  ;;  %v478_v20 = vsel %vm2556_vm6, %v473_v12, %v477_v63  ;;  %v487_v22 = vrot.slane %v486_v14, 4  ;;  %v491_v23 = vrot.slane %v489_v0, 5  ;;  %v507_v24 = vshll.u32 %v2570_v7, 16  ;;  %2322 = vmatpush3.bf16.msra.mxu0 %v2409_v61 }
  0x25   : > { %v2223_v26 = vcombine.low %v468_v4, %v478_v20  ;;  %v517_v1 = vshrl.u32 %v271_v5, 16  ;;  %415 = vst.msk [vmem:[#allocation2 + $0x18] sm:$0xff] %vm411_vm0, %v2586_v17  ;;  %v506_v6 = vrot.slane %v504_v19, 4  ;;  %v501_v28 = vrot.slane %v499_v16, 5  ;;  %2361 = vmatpush3.bf16.msra.mxu1 %v2409_v61 }
  0x26   : > { %v496_v27 = vor.u32 %v495_v15, %v491_v23  ;;  %v509_v29 = vrot.slane %v507_v24, 5  ;;  %v513_v30 = vshll.u32 %v271_v5, 16  ;;  %v523_v32 = vshll.u32 %v272_v25, 16 }
  0x27   : > { %1347 = vrot.lane.b32.xlu1 %v2576_v10, %s2443_s24  ;;  %v519_v31 = vrot.slane %v517_v1, 4  ;;  %v970_v33 = vrot.slane %v271_v5, 5  ;;  %v492_v34 = vsel %vm2556_vm6, %v487_v22, %v491_v23  ;;  %v2609_v40 = vcombine.low %v2602_v38, %v2605_v39  ;;  %v2667_v5 = vld [vmem:[%s2499_s22 + $0x44] sm:$0x1]  ;;  %v2673_v23 = vld [vmem:[%s2499_s22 + $0x48] sm:$0xf] }
  0x28   : > { %865 = vrot.lane.b32.xlu0 %v2223_v26, %s2445_s26  ;;  %v497_v35 = vrot.slane %v496_v27, 4  ;;  %v510_v36 = vor.u32 %v509_v29, %v506_v6  ;;  %v515_v37 = vrot.slane %v513_v30, 5  ;;  %v525_v44 = vrot.slane %v523_v32, 5 }
  0x29   : > { %v2241_v47 = vrot.slane %v2570_v7, 9  ;;  %v972_v48 = vrot.slane %v970_v33, 4  ;;  %v973_v49 = vrot.slane %v272_v25, 5  ;;  %416 = vst.msk [vmem:[#allocation2 + $0x20] sm:$0xff] %vm411_vm0, %v2609_v40  ;;  %v528_v51 = vshrl.u32 %v2602_v38, 16 }
  0x2a   : > { %v502_v41 = vsel %vm2556_vm6, %v497_v35, %v501_v28  ;;  %v511_v42 = vrot.slane %v510_v36, 4  ;;  %v520_v43 = vor.u32 %v519_v31, %v515_v37  ;;  %v531_v53 = vshll.u32 %v2602_v38, 16  ;;  %v2687_v28 = vld [vmem:[%s2499_s22 + $0x4c] sm:$0xf] }
  0x2b   : > { %v2616_v46 = vcombine.low %v492_v34, %v502_v41  ;;  %v541_v58 = vshrl.u32 %v2605_v39, 16  ;;  %v537_v59 = vshll.u32 %v2605_v39, 16  ;;  %v971_v62 = vsel %vm2519_vm5, %v2241_v47, %v970_v33  ;;  %v2697_v33 = vld [vmem:[%s2499_s22 + $0x50] sm:$0x1] }
  0x2c   : > { %1269 = vrot.lane.b32.xlu0 %v2223_v26, %s2446_s29  ;;  %v521_v50 = vrot.slane %v520_v43, 4  ;;  %v516_v56 = vsel %vm2556_vm6, %v511_v42, %v515_v37  ;;  %v974_v63 = vsel %vm2519_vm5, %v972_v48, %v973_v49  ;;  %v530_v2 = vrot.slane %v528_v51, 4 }
  0x2d   : > { %1271 = vrot.lane.b32.xlu1 %v2616_v46, %s2446_s29  ;;  %v533_v7 = vrot.slane %v531_v53, 5  ;;  %v2652_v8 = vcombine.low %v2630_v55, %v2639_v60  ;;  %v552_v9 = vshrl.u32 %v2630_v55, 16  ;;  %v547_v11 = vshll.u32 %v2627_v54, 16  ;;  %v2716_v53 = vld [vmem:[%s2499_s22 + $0x54] sm:$0xf] }
  0x2e   : > { %v526_v57 = vsel %vm2556_vm6, %v521_v50, %v525_v44  ;;  %v555_v12 = vshll.u32 %v2630_v55, 16  ;;  %v2662_v14 = vrot.slane %v537_v59, 5  ;;  %v543_v0 = vrot.slane %v541_v58, 4  ;;  %v2721_v59 = vld [vmem:[%s2499_s22 + $0x58] sm:$0xf] }
  0x2f   : > { %v2657_v4 = vcombine.low %v516_v56, %v526_v57  ;;  %417 = vst.msk [vmem:[#allocation2 + $0x28] sm:$0xff] %vm411_vm0, %v2652_v8  ;;  %v561_v15 = vshll.u32 %v2639_v60, 16  ;;  %v2242_v16 = vrot.slane %v2602_v38, 9  ;;  %v977_v19 = vrot.slane %v2605_v39, 5 }
  0x30   : > { %1415 = vrot.lane.b32.xlu0 %v2510_v3, %s2447_s6  ;;  %v565_v3 = vshrl.u32 %v2639_v60, 16  ;;  %v554_v20 = vrot.slane %v552_v9, 4  ;;  %v557_v22 = vrot.slane %v555_v12, 5  ;;  %v2677_v24 = vcombine.low %v971_v62, %v974_v63 }
  0x31   : > { %1417 = vrot.lane.b32.xlu1 %v2586_v17, %s2447_s6  ;;  %v980_v25 = vrot.slane %v2627_v54, 5  ;;  %v534_v26 = vor.u32 %v533_v7, %v530_v2  ;;  %v2682_v1 = vrot.slane %v547_v11, 5  ;;  %v2684_v6 = vrot.slane %v561_v15, 5 }
  0x32   : > { %v567_v27 = vrot.slane %v565_v3, 4  ;;  %v544_v29 = vor.u32 %v543_v0, %v2662_v14  ;;  %v571_v30 = vshll.u32 %v2667_v5, 16  ;;  %v2693_v31 = vcombine.low %v2673_v23, %v2687_v28 }
  0x33   : > { %v576_v32 = vshrl.u32 %v2673_v23, 16  ;;  %v2701_v34 = vsel %vm2519_vm5, %v2242_v16, %v977_v19  ;;  %v979_v35 = vrot.slane %v977_v19, 4  ;;  %v558_v36 = vor.u32 %v557_v22, %v554_v20  ;;  %v2751_v22 = vld [vmem:[%s2499_s22 + $0x5c] sm:$0x1] }
  0x34   : > { %1507 = vrot.lane.b32.xlu0 %v2616_v46, %s2448_s7  ;;  %v579_v37 = vshll.u32 %v2673_v23, 16  ;;  %v984_v38 = vrot.slane %v2639_v60, 5  ;;  %v589_v39 = vshrl.u32 %v2687_v28, 16  ;;  %418 = vst.msk [vmem:[#allocation2 + $0x30] sm:$0xff] %vm411_vm0, %v2693_v31  ;;  %v585_v42 = vshll.u32 %v2687_v28, 16 }
  0x35   : > { %1509 = vrot.lane.b32.xlu1 %v2657_v4, %s2448_s7  ;;  %v578_v41 = vrot.slane %v576_v32, 4  ;;  %v535_v43 = vrot.slane %v534_v26, 4  ;;  %v568_v44 = vor.u32 %v567_v27, %v2684_v6  ;;  %v595_v47 = vshll.u32 %v2697_v33, 16  ;;  %v2774_v32 = vld [vmem:[%s2499_s22 + $0x64] sm:$0xf] }
  0x36   : > { %v581_v45 = vrot.slane %v579_v37, 5  ;;  %v545_v48 = vrot.slane %v544_v29, 4  ;;  %v573_v49 = vrot.slane %v571_v30, 5  ;;  %v587_v50 = vrot.slane %v585_v42, 5 }
  0x37   : > { %v591_v51 = vrot.slane %v589_v39, 4  ;;  %v559_v54 = vrot.slane %v558_v36, 4  ;;  %v2243_v56 = vrot.slane %v2630_v55, 9  ;;  %v987_v57 = vrot.slane %v2667_v5, 5 }
  0x38   : > { %1583 = vrot.lane.b32.xlu0 %v2576_v10, %s2449_s8  ;;  %v582_v58 = vor.u32 %v581_v45, %v578_v41  ;;  %v991_v61 = vrot.slane %v2687_v28, 5  ;;  %v2728_v62 = vcombine.low %v2716_v53, %v2721_v59  ;;  %v569_v55 = vrot.slane %v568_v44, 4 }
  0x39   : > { %867 = vrot.lane.b32.xlu1 %v2616_v46, %s2445_s26  ;;  %v986_v46 = vrot.slane %v984_v38, 4  ;;  %v592_v60 = vor.u32 %v591_v51, %v587_v50  ;;  %v597_v63 = vrot.slane %v595_v47, 5  ;;  %v600_v2 = vshrl.u32 %v2716_v53, 16  ;;  %v2806_v47 = vld [vmem:[%s2499_s22 + $0x68] sm:$0x1] }
  0x3a   : > { %v603_v7 = vshll.u32 %v2716_v53, 16  ;;  %v583_v9 = vrot.slane %v582_v58, 4  ;;  %v2244_v12 = vrot.slane %v2673_v23, 9  ;;  %v613_v3 = vshrl.u32 %v2721_v59, 16  ;;  %419 = vst.msk [vmem:[#allocation2 + $0x38] sm:$0xff] %vm411_vm0, %v2728_v62 }
  0x3b   : > { %v593_v11 = vrot.slane %v592_v60, 4  ;;  %v981_v0 = vsel %vm2519_vm5, %v979_v35, %v980_v25  ;;  %v993_v5 = vrot.slane %v991_v61, 4  ;;  %v994_v15 = vrot.slane %v2697_v33, 5 }
  0x3c   : > { %1585 = vrot.lane.b32.xlu0 %v2677_v24, %s2449_s8  ;;  %v609_v16 = vshll.u32 %v2721_v59, 16  ;;  %v540_v19 = vsel %vm2556_vm6, %v535_v43, %v2662_v14  ;;  %v550_v20 = vsel %vm2556_vm6, %v545_v48, %v2682_v1  ;;  %v602_v23 = vrot.slane %v600_v2, 4  ;;  %v288_v48 = vld [vmem:[%s2499_s22 + $0x6c] sm:$0xf] }
  0x3d   : > { %869 = vrot.lane.b32.xlu1 %v2657_v4, %s2445_s26  ;;  %v605_v25 = vrot.slane %v603_v7, 5  ;;  %v574_v26 = vsel %vm2556_vm6, %v569_v55, %v573_v49  ;;  %v985_v14 = vsel %vm2519_vm5, %v2243_v56, %v984_v38  ;;  %v988_v1 = vsel %vm2519_vm5, %v986_v46, %v987_v57  ;;  %v290_v55 = vld [vmem:[%s2499_s22 + $0x74] sm:$0x1] }
  0x3e   : > { %v588_v27 = vsel %vm2556_vm6, %v583_v9, %v587_v50  ;;  %v598_v28 = vsel %vm2556_vm6, %v593_v11, %v597_v63  ;;  %v992_v29 = vsel %vm2519_vm5, %v2244_v12, %v991_v61  ;;  %v615_v30 = vrot.slane %v613_v3, 4 }
  0x3f   : > { %v995_v33 = vsel %vm2519_vm5, %v993_v5, %v994_v15  ;;  %v2778_v35 = vrot.slane %v609_v16, 5  ;;  %v619_v36 = vshll.u32 %v2751_v22, 16  ;;  %v606_v38 = vor.u32 %v605_v25, %v602_v23 }
  0x40   : > { %1111 = vrot.lane.b32.xlu0 %v2576_v10, %s2444_s25  ;;  %v564_v10 = vsel %vm2556_vm6, %v559_v54, %v2684_v6  ;;  %v2771_v6 = vld [vmem:[%s2499_s22 + $0x60] sm:$0xf]  ;;  %v2789_v39 = vcombine.low %v540_v19, %v550_v20  ;;  %v2792_v41 = vcombine.low %v2701_v34, %v981_v0  ;;  %v2794_v42 = vcombine.low %v985_v14, %v988_v1  ;;  %v289_v54 = vld [vmem:[%s2499_s22 + $0x70] sm:$0xf] }
  0x41   : > { %1113 = vrot.lane.b32.xlu1 %v2677_v24, %s2444_s25  ;;  %v2783_v37 = vcombine.low %v2771_v6, %v2774_v32  ;;  %v2798_v43 = vcombine.low %v564_v10, %v574_v26  ;;  %v2800_v44 = vcombine.low %v588_v27, %v598_v28  ;;  %v2245_v45 = vrot.slane %v2716_v53, 9 }
  0x42   : > { %v616_v34 = vor.u32 %v615_v30, %v2778_v35  ;;  %v2810_v49 = vrot.slane %v619_v36, 5  ;;  %v998_v50 = vrot.slane %v2721_v59, 5  ;;  %v1001_v51 = vrot.slane %v2751_v22, 5  ;;  %v292_v36 = vld [vmem:[%s2499_s22 + $0x7c] sm:$0xf] }
  0x43   : > { %420 = vst.msk [vmem:[#allocation2 + $0x40] sm:$0xff] %vm411_vm0, %v2783_v37  ;;  %v2817_v56 = vrot.slane %v606_v38, 4  ;;  %v2246_v53 = vrot.slane %v2771_v6, 9  ;;  %v1005_v57 = vrot.slane %v2774_v32, 5  ;;  %v1008_v58 = vrot.slane %v2806_v47, 5 }
  0x44   : > { %1181 = vrot.lane.b32.xlu0 %v2586_v17, %s2442_s23  ;;  %v2802_v17 = vcombine.low %v992_v29, %v995_v33  ;;  %v624_v46 = vshrl.u32 %v2771_v6, 16  ;;  %v627_v59 = vshll.u32 %v2771_v6, 16  ;;  %v2826_v60 = vcombine.low %v288_v48, %v289_v54  ;;  %v291_v29 = vld [vmem:[%s2499_s22 + $0x78] sm:$0xf] }
  0x45   : > { %1183 = vrot.lane.b32.xlu1 %v2609_v40, %s2442_s23  ;;  %v648_v61 = vshrl.u32 %v288_v48, 16  ;;  %v1007_v63 = vrot.slane %v1005_v57, 4  ;;  %v651_v2 = vshll.u32 %v288_v48, 16  ;;  %v661_v7 = vshrl.u32 %v289_v54, 16 }
  0x46   : > { %v617_v9 = vrot.slane %v616_v34, 4  ;;  %v2833_v11 = vsel %vm2519_vm5, %v2245_v45, %v998_v50  ;;  %421 = vst.msk [vmem:[#allocation2 + $0x48] sm:$0xff] %vm411_vm0, %v2826_v60  ;;  %v657_v3 = vshll.u32 %v289_v54, 16  ;;  %v667_v16 = vshll.u32 %v290_v55, 16 }
  0x47   : > { %v650_v12 = vrot.slane %v648_v61, 4  ;;  %v1009_v0 = vsel %vm2519_vm5, %v1007_v63, %v1008_v58  ;;  %v653_v5 = vrot.slane %v651_v2, 5  ;;  %v663_v15 = vrot.slane %v661_v7, 4  ;;  %v295_v2 = vld [vmem:[%s2499_s22 + $0x88] sm:$0xf] }
  0x48   : > { %1273 = vrot.lane.b32.xlu0 %v2657_v4, %s2446_s29  ;;  %v1006_v4 = vsel %vm2519_vm5, %v2246_v53, %v1005_v57  ;;  %v1000_v19 = vrot.slane %v998_v50, 4  ;;  %v637_v20 = vshrl.u32 %v2774_v32, 16  ;;  %v659_v23 = vrot.slane %v657_v3, 5  ;;  %v293_v50 = vld [vmem:[%s2499_s22 + $0x80] sm:$0x1] }
  0x49   : > { %1275 = vrot.lane.b32.xlu1 %v2789_v39, %s2446_s29  ;;  %v2844_v22 = vcombine.low %v1006_v4, %v1009_v0  ;;  %v2850_v25 = vrot.slane %v624_v46, 4  ;;  %v654_v10 = vor.u32 %v653_v5, %v650_v12  ;;  %v669_v26 = vrot.slane %v667_v16, 5  ;;  %v2411_v0 = vld [vmem:[%s3479_s1 + $0x10] ss:$0 sps:$4 sm:$0x33]  }
  0x4a   : > { %v664_v14 = vor.u32 %v663_v15, %v659_v23  ;;  %v2206_v1 = vcombine.low %v2528_v18, %v2533_v21  ;;  %v2247_v27 = vrot.slane %v288_v48, 9  ;;  %v1012_v28 = vrot.slane %v289_v54, 5  ;;  %2363 = vmatprep.subr.msk.bf16.mxu0 %vm1733_vm7, %v2411_v0  ;;  %2364 = vmatprep.subr.msk.bf16.mxu1 %vm1733_vm7, %v2411_v0 }
  0x4b   : > { %v2857_v30 = vrot.slane %v627_v59, 5  ;;  %v633_v6 = vshll.u32 %v2774_v32, 16  ;;  %v655_v33 = vrot.slane %v654_v10, 4  ;;  %v622_v18 = vsel %vm2556_vm6, %v617_v9, %v2810_v49  ;;  %v294_v59 = vld [vmem:[%s2499_s22 + $0x84] sm:$0xf] }
  0x4c   : > { %1349 = vrot.lane.b32.xlu0 %v2677_v24, %s2443_s24  ;;  %v612_v24 = vsel %vm2556_vm6, %v2817_v56, %v2778_v35  ;;  %v1015_v35 = vrot.slane %v290_v55, 5  ;;  %v665_v21 = vrot.slane %v664_v14, 4  ;;  %412 = vst.msk [vmem:[#allocation2] sm:$0xff] %vm411_vm0, %v2206_v1  ;;  %v1014_v38 = vrot.slane %v1012_v28, 4 }
  0x4d   : > { %1351 = vrot.lane.b32.xlu1 %v2792_v41, %s2443_s24  ;;  %v2871_v32 = vsel %vm2519_vm5, %v1000_v19, %v1001_v51  ;;  %v660_v45 = vsel %vm2556_vm6, %v655_v33, %v659_v23  ;;  %v2875_v48 = vcombine.low %v291_v29, %v292_v36  ;;  %v672_v34 = vshrl.u32 %v291_v29, 16 }
  0x4e   : > { %v670_v49 = vsel %vm2556_vm6, %v665_v21, %v669_v26  ;;  %v1016_v54 = vsel %vm2519_vm5, %v1014_v38, %v1015_v35  ;;  %v675_v56 = vshll.u32 %v291_v29, 16  ;;  %v685_v53 = vshrl.u32 %v292_v36, 16 }
  0x4f   : > { %v2884_v51 = vrot.slane %v637_v20, 4  ;;  %v2886_v57 = vcombine.low %v660_v45, %v670_v49  ;;  %422 = vst.msk [vmem:[#allocation2 + $0x50] sm:$0xff] %vm411_vm0, %v2875_v48  ;;  %v674_v46 = vrot.slane %v672_v34, 4  ;;  %v681_v55 = vshll.u32 %v292_v36, 16  ;;  %v297_v34 = vld [vmem:[%s2499_s22 + $0x90] sm:$0xf] }
  0x50   : > { %1419 = vrot.lane.b32.xlu0 %v2609_v40, %s2447_s6  ;;  %v1013_v40 = vsel %vm2519_vm5, %v2247_v27, %v1012_v28  ;;  %v677_v61 = vrot.slane %v675_v56, 5  ;;  %v687_v4 = vrot.slane %v685_v53, 4  ;;  %v691_v63 = vshll.u32 %v293_v50, 16  ;;  %v296_v27 = vld [vmem:[%s2499_s22 + $0x8c] sm:$0x1] }
  0x51   : > { %1421 = vrot.lane.b32.xlu1 %v2652_v8, %s2447_s6  ;;  %v2888_v58 = vcombine.low %v1013_v40, %v1016_v54  ;;  %v2896_v7 = vcombine.low %v612_v24, %v622_v18  ;;  %v2248_v9 = vrot.slane %v291_v29, 9  ;;  %v1019_v12 = vrot.slane %v292_v36, 5  ;;  %v298_v53 = vld [vmem:[%s2499_s22 + $0x94] sm:$0xf] }
  0x52   : > { %v1022_v3 = vrot.slane %v293_v50, 5  ;;  %v678_v5 = vor.u32 %v677_v61, %v674_v46  ;;  %v683_v15 = vrot.slane %v681_v55, 5  ;;  %v693_v16 = vrot.slane %v691_v63, 5  ;;  %v299_v63 = vld [vmem:[%s2499_s22 + $0x98] sm:$0x1] }
  0x53   : > { %v2901_v19 = vcombine.low %v294_v59, %v295_v2  ;;  %v1020_v20 = vsel %vm2519_vm5, %v2248_v9, %v1019_v12  ;;  %v1021_v23 = vrot.slane %v1019_v12, 4  ;;  %v696_v24 = vshrl.u32 %v294_v59, 16 }
  0x54   : > { %1511 = vrot.lane.b32.xlu0 %v2789_v39, %s2448_s7  ;;  %v699_v10 = vshll.u32 %v294_v59, 16  ;;  %v679_v26 = vrot.slane %v678_v5, 4  ;;  %v688_v14 = vor.u32 %v687_v4, %v683_v15  ;;  %v709_v1 = vshrl.u32 %v295_v2, 16 }
  0x55   : > { %1513 = vrot.lane.b32.xlu1 %v2798_v43, %s2448_s7  ;;  %423 = vst.msk [vmem:[#allocation2 + $0x58] sm:$0xff] %vm411_vm0, %v2901_v19  ;;  %v2912_v28 = vrot.slane %v633_v6, 5  ;;  %v1023_v29 = vsel %vm2519_vm5, %v1021_v23, %v1022_v3  ;;  %v1735_v33 = vsel %vm1733_vm7, %v2411_v0, 0  ;;  %v698_v35 = vrot.slane %v696_v24, 4 }
  0x56   : > { %v689_v36 = vrot.slane %v688_v14, 4  ;;  %v2918_v18 = vcombine.low %v1020_v20, %v1023_v29  ;;  %2324 = vmatpush3.bf16.msra.mxu0 %v1735_v33  ;;  %v701_v21 = vrot.slane %v699_v10, 5  ;;  %2362 = vmatpush3.bf16.msra.mxu1 %v1735_v33  ;;  %v705_v6 = vshll.u32 %v295_v2, 16 }
  0x57   : > { %v711_v40 = vrot.slane %v709_v1, 4  ;;  %v715_v38 = vshll.u32 %v296_v27, 16  ;;  %v2249_v45 = vrot.slane %v294_v59, 9  ;;  %v1026_v54 = vrot.slane %v295_v2, 5  ;;  %v300_v1 = vld [vmem:[%s2499_s22 + $0x9c] sm:$0xf] }
  0x58   : > { %1587 = vrot.lane.b32.xlu0 %v2792_v41, %s2449_s8  ;;  %v694_v50 = vsel %vm2556_vm6, %v689_v36, %v693_v16  ;;  %v702_v49 = vor.u32 %v701_v21, %v698_v35  ;;  %v1029_v56 = vrot.slane %v296_v27, 5  ;;  %v707_v61 = vrot.slane %v705_v6, 5 }
  0x59   : > { %871 = vrot.lane.b32.xlu1 %v2789_v39, %s2445_s26  ;;  %v684_v39 = vsel %vm2556_vm6, %v679_v26, %v683_v15  ;;  %v717_v55 = vrot.slane %v715_v38, 5  ;;  %v2930_v4 = vcombine.low %v297_v34, %v298_v53  ;;  %v1027_v59 = vsel %vm2519_vm5, %v2249_v45, %v1026_v54  ;;  %v302_v38 = vld [vmem:[%s2499_s22 + $0xa4] sm:$0x1] }
  0x5a   : > { %v2928_v46 = vcombine.low %v684_v39, %v694_v50  ;;  %v703_v9 = vrot.slane %v702_v49, 4  ;;  %v1028_v12 = vrot.slane %v1026_v54, 4  ;;  %v720_v3 = vshrl.u32 %v297_v34, 16  ;;  %v301_v39 = vld [vmem:[%s2499_s22 + $0xa0] sm:$0xf] }
  0x5b   : > { %v712_v2 = vor.u32 %v711_v40, %v707_v61  ;;  %v723_v0 = vshll.u32 %v297_v34, 16  ;;  %v733_v5 = vshrl.u32 %v298_v53, 16  ;;  %424 = vst.msk [vmem:[#allocation2 + $0x60] sm:$0xff] %vm411_vm0, %v2930_v4  ;;  %v729_v15 = vshll.u32 %v298_v53, 16 }
  0x5c   : > { %1589 = vrot.lane.b32.xlu0 %v2794_v42, %s2449_s8  ;;  %v708_v16 = vsel %vm2556_vm6, %v703_v9, %v707_v61  ;;  %v1030_v20 = vsel %vm2519_vm5, %v1028_v12, %v1029_v56  ;;  %v722_v23 = vrot.slane %v720_v3, 4  ;;  %v739_v24 = vshll.u32 %v299_v63, 16 }
  0x5d   : > { %873 = vrot.lane.b32.xlu1 %v2798_v43, %s2445_s26  ;;  %v2945_v10 = vcombine.low %v1027_v59, %v1030_v20  ;;  %v725_v26 = vrot.slane %v723_v0, 5  ;;  %v731_v14 = vrot.slane %v729_v15, 5  ;;  %v735_v27 = vrot.slane %v733_v5, 4  ;;  %v303_v0 = vld [vmem:[%s2499_s22 + $0xa8] sm:$0xf] }
  0x5e   : > { %v741_v29 = vrot.slane %v739_v24, 5  ;;  %v2250_v33 = vrot.slane %v297_v34, 9  ;;  %v1033_v35 = vrot.slane %v298_v53, 5  ;;  %v1036_v6 = vrot.slane %v299_v63, 5 }
  0x5f   : > { %v726_v21 = vor.u32 %v725_v26, %v722_v23  ;;  %v2953_v40 = vcombine.low %v300_v1, %v301_v39  ;;  %v736_v50 = vor.u32 %v735_v27, %v731_v14  ;;  %v744_v54 = vshrl.u32 %v300_v1, 16  ;;  %v304_v26 = vld [vmem:[%s2499_s22 + $0xac] sm:$0xf] }
  0x60   : > { %1115 = vrot.lane.b32.xlu0 %v2792_v41, %s2444_s25  ;;  %v713_v41 = vrot.slane %v712_v2, 4  ;;  %v1034_v34 = vsel %vm2519_vm5, %v2250_v33, %v1033_v35  ;;  %v1035_v49 = vrot.slane %v1033_v35, 4  ;;  %v747_v56 = vshll.u32 %v300_v1, 16 }
  0x61   : > { %1117 = vrot.lane.b32.xlu1 %v2794_v42, %s2444_s25  ;;  %v757_v53 = vshrl.u32 %v301_v39, 16  ;;  %425 = vst.msk [vmem:[#allocation2 + $0x68] sm:$0xff] %vm411_vm0, %v2953_v40  ;;  %v737_v61 = vrot.slane %v736_v50, 4  ;;  %v753_v63 = vshll.u32 %v301_v39, 16  ;;  %v763_v9 = vshll.u32 %v302_v38, 16 }
  0x62   : > { %v718_v36 = vsel %vm2556_vm6, %v713_v41, %v717_v55  ;;  %v1037_v55 = vsel %vm2519_vm5, %v1035_v49, %v1036_v6  ;;  %v746_v3 = vrot.slane %v744_v54, 4  ;;  %v749_v2 = vrot.slane %v747_v56, 5 }
  0x63   : > { %v2958_v45 = vcombine.low %v708_v16, %v718_v36  ;;  %v2970_v12 = vcombine.low %v1034_v34, %v1037_v55  ;;  %v742_v5 = vsel %vm2556_vm6, %v737_v61, %v741_v29  ;;  %v755_v15 = vrot.slane %v753_v63, 5  ;;  %v305_v36 = vld [vmem:[%s2499_s22 + $0xb0] sm:$0x1]  ;;  %v306_v63 = vld [vmem:[%s2499_s22 + $0xb4] sm:$0xf] }
  0x64   : > { %1185 = vrot.lane.b32.xlu0 %v2652_v8, %s2442_s23  ;;  %v727_v8 = vrot.slane %v726_v21, 4  ;;  %v759_v16 = vrot.slane %v757_v53, 4  ;;  %v765_v20 = vrot.slane %v763_v9, 5  ;;  %v2251_v24 = vrot.slane %v300_v1, 9  ;;  %v307_v9 = vld [vmem:[%s2499_s22 + $0xb8] sm:$0xf] }
  0x65   : > { %1187 = vrot.lane.b32.xlu1 %v2693_v31, %s2442_s23  ;;  %v1040_v41 = vrot.slane %v301_v39, 5  ;;  %v1043_v27 = vrot.slane %v302_v38, 5  ;;  %v2980_v33 = vcombine.low %v303_v0, %v304_v26  ;;  %v768_v35 = vshrl.u32 %v303_v0, 16 }
  0x66   : > { %v732_v59 = vsel %vm2556_vm6, %v727_v8, %v731_v14  ;;  %v760_v14 = vor.u32 %v759_v16, %v755_v15  ;;  %v771_v50 = vshll.u32 %v303_v0, 16  ;;  %v781_v39 = vshrl.u32 %v304_v26, 16 }
  0x67   : > { %v2977_v23 = vcombine.low %v732_v59, %v742_v5  ;;  %v1041_v29 = vsel %vm2519_vm5, %v2251_v24, %v1040_v41  ;;  %v1042_v6 = vrot.slane %v1040_v41, 4  ;;  %426 = vst.msk [vmem:[#allocation2 + $0x70] sm:$0xff] %vm411_vm0, %v2980_v33  ;;  %v770_v38 = vrot.slane %v768_v35, 4  ;;  %v308_v35 = vld [vmem:[%s2499_s22 + $0xbc] sm:$0x1] }
  0x68   : > { %1277 = vrot.lane.b32.xlu0 %v2798_v43, %s2446_s29  ;;  %v750_v43 = vor.u32 %v749_v2, %v746_v3  ;;  %v761_v1 = vrot.slane %v760_v14, 4  ;;  %v777_v34 = vshll.u32 %v304_v26, 16  ;;  %v773_v8 = vrot.slane %v771_v50, 5 }
  0x69   : > { %1279 = vrot.lane.b32.xlu1 %v2800_v44, %s2446_s29  ;;  %v1044_v49 = vsel %vm2519_vm5, %v1042_v6, %v1043_v27  ;;  %v787_v54 = vshll.u32 %v305_v36, 16  ;;  %v783_v55 = vrot.slane %v781_v39, 4  ;;  %v2252_v5 = vrot.slane %v303_v0, 9 }
  0x6a   : > { %v751_v21 = vrot.slane %v750_v43, 4  ;;  %v766_v56 = vsel %vm2556_vm6, %v761_v1, %v765_v20  ;;  %v2997_v53 = vcombine.low %v1041_v29, %v1044_v49  ;;  %v779_v61 = vrot.slane %v777_v34, 5 }
  0x6b   : > { %v774_v3 = vor.u32 %v773_v8, %v770_v38  ;;  %v789_v2 = vrot.slane %v787_v54, 5  ;;  %v1047_v16 = vrot.slane %v304_v26, 5  ;;  %v1050_v20 = vrot.slane %v305_v36, 5 }
  0x6c   : > { %1353 = vrot.lane.b32.xlu0 %v2794_v42, %s2443_s24  ;;  %v756_v42 = vsel %vm2556_vm6, %v751_v21, %v755_v15  ;;  %v784_v15 = vor.u32 %v783_v55, %v779_v61  ;;  %v3007_v43 = vcombine.low %v306_v63, %v307_v9  ;;  %v792_v41 = vshrl.u32 %v306_v63, 16 }
  0x6d   : > { %1355 = vrot.lane.b32.xlu1 %v2802_v17, %s2443_s24  ;;  %v3003_v59 = vcombine.low %v756_v42, %v766_v56  ;;  %v775_v24 = vrot.slane %v774_v3, 4  ;;  %v795_v14 = vshll.u32 %v306_v63, 16  ;;  %v805_v27 = vshrl.u32 %v307_v9, 16 }
  0x6e   : > { %v785_v21 = vrot.slane %v784_v15, 4  ;;  %v1049_v29 = vrot.slane %v1047_v16, 4  ;;  %427 = vst.msk [vmem:[#allocation2 + $0x78] sm:$0xff] %vm411_vm0, %v3007_v43  ;;  %v801_v0 = vshll.u32 %v307_v9, 16  ;;  %v794_v36 = vrot.slane %v792_v41, 4 }
  0x6f   : > { %v780_v26 = vsel %vm2556_vm6, %v775_v24, %v779_v61  ;;  %v797_v6 = vrot.slane %v795_v14, 5  ;;  %v807_v50 = vrot.slane %v805_v27, 4  ;;  %v811_v34 = vshll.u32 %v308_v35, 16 }
  0x70   : > { %1423 = vrot.lane.b32.xlu0 %v2693_v31, %s2447_s6  ;;  %v1048_v31 = vsel %vm2519_vm5, %v2252_v5, %v1047_v16  ;;  %v790_v1 = vsel %vm2556_vm6, %v785_v21, %v789_v2  ;;  %v1051_v39 = vsel %vm2519_vm5, %v1049_v29, %v1050_v20  ;;  %v803_v38 = vrot.slane %v801_v0, 5 }
  0x71   : > { %1425 = vrot.lane.b32.xlu1 %v2728_v62, %s2447_s6  ;;  %v3024_v42 = vcombine.low %v780_v26, %v790_v1  ;;  %v3026_v49 = vcombine.low %v1048_v31, %v1051_v39  ;;  %v798_v8 = vor.u32 %v797_v6, %v794_v36  ;;  %v1054_v54 = vrot.slane %v307_v9, 5 }
  0x72   : > { %v2261_v56 = vcombine.low %v2833_v11, %v2871_v32  ;;  %v808_v61 = vor.u32 %v807_v50, %v803_v38  ;;  %v813_v55 = vrot.slane %v811_v34, 5  ;;  %v2253_v2 = vrot.slane %v306_v63, 9 }
  0x73   : > { %v799_v3 = vrot.slane %v798_v8, 4  ;;  %v1056_v5 = vrot.slane %v1054_v54, 4  ;;  %v1057_v15 = vrot.slane %v308_v35, 5  ;;  %v630_v16 = vor.u32 %v2857_v30, %v2850_v25 }
  0x74   : > { %1515 = vrot.lane.b32.xlu0 %v2800_v44, %s2448_s7  ;;  %v643_v9 = vshll.u32 %v2806_v47, 16  ;;  %v809_v20 = vrot.slane %v808_v61, 4  ;;  %v640_v11 = vor.u32 %v2884_v51, %v2912_v28  ;;  %v1055_v63 = vsel %vm2519_vm5, %v2253_v2, %v1054_v54 }
  0x75   : > { %1517 = vrot.lane.b32.xlu1 %v2896_v7, %s2448_s7  ;;  %v804_v32 = vsel %vm2556_vm6, %v799_v3, %v803_v38  ;;  %v1058_v24 = vsel %vm2519_vm5, %v1056_v5, %v1057_v15  ;;  %v631_v25 = vrot.slane %v630_v16, 4  ;;  %vm1684_vm0 = vcmask 293888  }
  0x76   : > { %v3047_v41 = vcombine.low %v1055_v63, %v1058_v24  ;;  %v641_v30 = vrot.slane %v640_v11, 4  ;;  %v645_v51 = vrot.slane %v643_v9, 5 }
  0x77   : > { %v636_v14 = vsel %vm2556_vm6, %v631_v25, %v2912_v28 }
  0x78   : > { %1591 = vrot.lane.b32.xlu0 %v2802_v17, %s2449_s8  ;;  %v646_v27 = vsel %vm2556_vm6, %v641_v30, %v645_v51 }
  0x79   : > { %875 = vrot.lane.b32.xlu1 %v2800_v44, %s2445_s26  ;;  %v814_v44 = vsel %vm2556_vm6, %v809_v20, %v813_v55  ;;  %v2230_v35 = vcombine.low %v636_v14, %v646_v27  ;;  %v3219_v27 = vld [vmem:[%s2499_s22 + $0xc0] sm:$0xf] }
  0x7a   : > { %v3050_v47 = vcombine.low %v804_v32, %v814_v44 }
  0x7c   : > { %1593 = vrot.lane.b32.xlu0 %v2261_v56, %s2449_s8 }
  0x7d   : > { %877 = vrot.lane.b32.xlu1 %v2896_v7, %s2445_s26 }
  0x80   : > { %1119 = vrot.lane.b32.xlu0 %v2802_v17, %s2444_s25 }
  0x81   : > { %1121 = vrot.lane.b32.xlu1 %v2261_v56, %s2444_s25 }
  0x84   : > { %1189 = vrot.lane.b32.xlu0 %v2728_v62, %s2442_s23 }
  0x85   : > { %1191 = vrot.lane.b32.xlu1 %v2783_v37, %s2442_s23 }
  0x87   : > { %v1180_v21 = vpop.permute.xlu1 %1179 }
  0x88   : > { %1281 = vrot.lane.b32.xlu0 %v2896_v7, %s2446_s29  ;;  %v1178_v17 = vpop.permute.xlu0 %1177 }
  0x89   : > { %1283 = vrot.lane.b32.xlu1 %v2230_v35, %s2446_s29 }
  0x8c   : > { %1357 = vrot.lane.b32.xlu0 %v2261_v56, %s2443_s24 }
  0x8d   : > { %1359 = vrot.lane.b32.xlu1 %v2844_v22, %s2443_s24 }
  0x8e   : > { %v1346_v62 = vpop.permute.xlu0 %1345 }
  0x90   : > { %1427 = vrot.lane.b32.xlu0 %v2783_v37, %s2447_s6 }
  0x91   : > { %1429 = vrot.lane.b32.xlu1 %v2826_v60, %s2447_s6  ;;  %v1108_v28 = vpop.permute.xlu1 %1107 }
  0x94   : > { %1519 = vrot.lane.b32.xlu0 %v2230_v35, %s2448_s7 }
  0x95   : > { %1521 = vrot.lane.b32.xlu1 %v2886_v57, %s2448_s7  ;;  %v1110_v7 = vpop.permute.xlu1 %1109 }
  0x96   : > { %v864_v31 = vpop.permute.xlu0 %863 }
  0x97   : > { %912 = vst.msk [vmem:[#allocation2] sm:$0xff] %vm911_vm8, %v864_v31 }
  0x98   : > { %1156 = vst.msk [vmem:[#allocation2] sm:$0xff] %vm1155_vm9, %v1108_v28  ;;  %1595 = vrot.lane.b32.xlu0 %v2844_v22, %s2449_s8 }
  0x99   : > { %879 = vrot.lane.b32.xlu1 %v2230_v35, %s2445_s26  ;;  %v1348_v37 = vpop.permute.xlu1 %1347  ;;  %1226 = vst.msk [vmem:[#allocation2] sm:$0xff] %vm1225_vm10, %v1178_v17  ;;  %v3222_v17 = vld [vmem:[%s2499_s22 + $0xc4] sm:$0xf] }
  0x9a   : > { %v866_v29 = vpop.permute.xlu0 %865  ;;  %v1252_v28 = vshll.u32 %v3222_v17, 16 }
  0x9b   : > { %913 = vst.msk [vmem:[#allocation2 + $0x8] sm:$0xff] %vm911_vm8, %v866_v29 }
  0x9c   : > { %1157 = vst.msk [vmem:[#allocation2 + $0x8] sm:$0xff] %vm1155_vm9, %v1110_v7  ;;  %1597 = vrot.lane.b32.xlu0 %v2888_v58, %s2449_s8 }
  0x9d   : > { %881 = vrot.lane.b32.xlu1 %v2886_v57, %s2445_s26  ;;  %1227 = vst.msk [vmem:[#allocation2 + $0x8] sm:$0xff] %vm1225_vm10, %v1180_v21  ;;  %v1243_v21 = vshrl.u32 %v3219_v27, 16 }
  0x9e   : > { %v1270_v0 = vpop.permute.xlu0 %1269 }
  0x9f   : > { %v1272_v26 = vpop.permute.xlu1 %1271  ;;  %1318 = vst.msk [vmem:[#allocation2] sm:$0xff] %vm1317_vm11, %v1270_v0  ;;  %v1254_v0 = vrot.slane %v1252_v28, 5 }
  0xa0   : > { %1319 = vst.msk [vmem:[#allocation2 + $0x8] sm:$0xff] %vm1317_vm11, %v1272_v26  ;;  %1123 = vrot.lane.b32.xlu0 %v2844_v22, %s2444_s25 }
  0xa1   : > { %1394 = vst.msk [vmem:[#allocation2] sm:$0xff] %vm1393_vm12, %v1346_v62  ;;  %1125 = vrot.lane.b32.xlu1 %v2888_v58, %s2444_s25  ;;  %1395 = vst.msk [vmem:[#allocation2 + $0x8] sm:$0xff] %vm1393_vm12, %v1348_v37  ;;  %v1256_v62 = vshrl.u32 %v3222_v17, 16 }
  0xa2   : > { %v1416_v36 = vpop.permute.xlu0 %1415 }
  0xa3   : > { %1464 = vst.msk [vmem:[#allocation2] sm:$0xff] %vm1463_vm13, %v1416_v36  ;;  %v1418_v6 = vpop.permute.xlu1 %1417  ;;  %v1258_v26 = vrot.slane %v1256_v62, 4 }
  0xa4   : > { %1465 = vst.msk [vmem:[#allocation2 + $0x8] sm:$0xff] %vm1463_vm13, %v1418_v6  ;;  %1193 = vrot.lane.b32.xlu0 %v2826_v60, %s2442_s23 }
  0xa5   : > { %1195 = vrot.lane.b32.xlu1 %v2875_v48, %s2442_s23 }
  0xa6   : > { %v1508_v22 = vpop.permute.xlu0 %1507 }
  0xa7   : > { %1556 = vst.msk [vmem:[#allocation2] sm:$0xff] %vm1555_vm14, %v1508_v22  ;;  %v1510_v50 = vpop.permute.xlu1 %1509  ;;  %v311_v22 = vld [vmem:[%s2499_s22 + $0xc8] sm:$0x1] }
  0xa8   : > { %1557 = vst.msk [vmem:[#allocation2 + $0x8] sm:$0xff] %vm1555_vm14, %v1510_v50  ;;  %1285 = vrot.lane.b32.xlu0 %v2886_v57, %s2446_s29 }
  0xa9   : > { %1287 = vrot.lane.b32.xlu1 %v2928_v46, %s2446_s29 }
  0xaa   : > { %v1584_v1 = vpop.permute.xlu0 %1583 }
  0xab   : > { %1632 = vst.msk [vmem:[#allocation2] sm:$0xff] %vm1631_vm15, %v1584_v1  ;;  %v868_v60 = vpop.permute.xlu1 %867 }
  0xac   : > { %914 = vst.msk [vmem:[#allocation2 + $0x10] sm:$0xff] %vm911_vm8, %v868_v60  ;;  %1361 = vrot.lane.b32.xlu0 %v2888_v58, %s2443_s24  ;;  %v1259_v60 = vor.u32 %v1258_v26, %v1254_v0 }
  0xad   : > { %1363 = vrot.lane.b32.xlu1 %v2918_v18, %s2443_s24 }
  0xae   : > { %v1586_v39 = vpop.permute.xlu0 %1585 }
  0xaf   : > { %1633 = vst.msk [vmem:[#allocation2 + $0x8] sm:$0xff] %vm1631_vm15, %v1586_v39  ;;  %v870_v57 = vpop.permute.xlu1 %869  ;;  %v1262_v39 = vshll.u32 %v311_v22, 16 }
  0xb0   : > { %915 = vst.msk [vmem:[#allocation2 + $0x18] sm:$0xff] %vm911_vm8, %v870_v57  ;;  %1431 = vrot.lane.b32.xlu0 %v2875_v48, %s2447_s6 }
  0xb1   : > { %1433 = vrot.lane.b32.xlu1 %v2901_v19, %s2447_s6 }
  0xb2   : > { %v1112_v38 = vpop.permute.xlu0 %1111  ;;  %v1648_v34 = vld [vmem:[#allocation2] sm:$0xff] }
  0xb3   : > { %1158 = vst.msk [vmem:[#allocation2 + $0x10] sm:$0xff] %vm1155_vm9, %v1112_v38  ;;  %v1114_v58 = vpop.permute.xlu1 %1113  ;;  %2325 = vmatprep.mubr.msk.bf16.mxu0 %vm1684_vm0, %v1648_v34  ;;  %v3250_v38 = vld [vmem:[%s2499_s22 + $0xcc] sm:$0xf] }
  0xb4   : > { %1159 = vst.msk [vmem:[#allocation2 + $0x18] sm:$0xff] %vm1155_vm9, %v1114_v58  ;;  %1523 = vrot.lane.b32.xlu0 %v2928_v46, %s2448_s7  ;;  %v3254_v58 = vld [vmem:[%s2499_s22 + $0xd0] sm:$0xf]  ;;  %v2276_v28 = vrot.slane %v3250_v38, 9 }
  0xb5   : > { %1525 = vrot.lane.b32.xlu1 %v2958_v45, %s2448_s7 }
  0xb6   : > { %v1182_v48 = vpop.permute.xlu0 %1181  ;;  %v1649_v8 = vld [vmem:[#allocation2 + $0x8] sm:$0xff] }
  0xb7   : > { %1228 = vst.msk [vmem:[#allocation2 + $0x10] sm:$0xff] %vm1225_vm10, %v1182_v48  ;;  %v1184_v54 = vpop.permute.xlu1 %1183  ;;  %2326 = vmatmul.mubr.msk.bf16.vlgmr.msra.gmra.mrb[0].mxu0 %vm1684_vm0, %v1649_v8  ;;  %v1264_v8 = vrot.slane %v1262_v39, 5 }
  0xb8   : > { %1229 = vst.msk [vmem:[#allocation2 + $0x18] sm:$0xff] %vm1225_vm10, %v1184_v54  ;;  %1599 = vrot.lane.b32.xlu0 %v2918_v18, %s2449_s8  ;;  %v1481_v54 = vshrl.u32 %v3250_v38, 16 }
  0xb9   : > { %883 = vrot.lane.b32.xlu1 %v2928_v46, %s2445_s26 }
  0xba   : > { %v1274_v56 = vpop.permute.xlu0 %1273 }
  0xbb   : > { %1320 = vst.msk [vmem:[#allocation2 + $0x10] sm:$0xff] %vm1317_vm11, %v1274_v56  ;;  %v1276_v61 = vpop.permute.xlu1 %1275  ;;  %v1484_v56 = vshll.u32 %v3250_v38, 16 }
  0xbc   : > { %1321 = vst.msk [vmem:[#allocation2 + $0x18] sm:$0xff] %vm1317_vm11, %v1276_v61  ;;  %1601 = vrot.lane.b32.xlu0 %v2945_v10, %s2449_s8 }
  0xbd   : > { %885 = vrot.lane.b32.xlu1 %v2958_v45, %s2445_s26 }
  0xbe   : > { %v1350_v55 = vpop.permute.xlu0 %1349 }
  0xbf   : > { %1396 = vst.msk [vmem:[#allocation2 + $0x10] sm:$0xff] %vm1393_vm12, %v1350_v55  ;;  %v1352_v3 = vpop.permute.xlu1 %1351  ;;  %v1337_v55 = vrot.slane %v3222_v17, 5 }
  0xc0   : > { %1397 = vst.msk [vmem:[#allocation2 + $0x18] sm:$0xff] %vm1393_vm12, %v1352_v3  ;;  %1127 = vrot.lane.b32.xlu0 %v2918_v18, %s2444_s25  ;;  %v1494_v3 = vshrl.u32 %v3254_v58, 16 }
  0xc1   : > { %1129 = vrot.lane.b32.xlu1 %v2945_v10, %s2444_s25 }
  0xc2   : > { %v1420_v46 = vpop.permute.xlu0 %1419 }
  0xc3   : > { %1466 = vst.msk [vmem:[#allocation2 + $0x10] sm:$0xff] %vm1463_vm13, %v1420_v46  ;;  %v1422_v2 = vpop.permute.xlu1 %1421  ;;  %v1490_v46 = vshll.u32 %v3254_v58, 16 }
  0xc4   : > { %1467 = vst.msk [vmem:[#allocation2 + $0x18] sm:$0xff] %vm1463_vm13, %v1422_v2  ;;  %1197 = vrot.lane.b32.xlu0 %v2901_v19, %s2442_s23 }
  0xc5   : > { %1199 = vrot.lane.b32.xlu1 %v2930_v4, %s2442_s23 }
  0xc6   : > { %v1512_v5 = vpop.permute.xlu0 %1511 }
  0xc7   : > { %1558 = vst.msk [vmem:[#allocation2 + $0x10] sm:$0xff] %vm1555_vm14, %v1512_v5  ;;  %v1514_v15 = vpop.permute.xlu1 %1513  ;;  %v2270_v5 = vcombine.low %v3219_v27, %v3222_v17  ;;  %v1575_v17 = vrot.slane %v3254_v58, 5 }
  0xc8   : > { %1559 = vst.msk [vmem:[#allocation2 + $0x18] sm:$0xff] %vm1555_vm14, %v1514_v15  ;;  %1289 = vrot.lane.b32.xlu0 %v2958_v45, %s2446_s29 }
  0xc9   : > { %1291 = vrot.lane.b32.xlu1 %v2977_v23, %s2446_s29  ;;  %v1576_v52 = vsel %vm2519_vm5, %v2276_v28, %v1575_v17 }
  0xca   : > { %v1588_v18 = vpop.permute.xlu0 %1587 }
  0xcb   : > { %1634 = vst.msk [vmem:[#allocation2 + $0x10] sm:$0xff] %vm1631_vm15, %v1588_v18  ;;  %v872_v16 = vpop.permute.xlu1 %871 }
  0xcc   : > { %916 = vst.msk [vmem:[#allocation2 + $0x20] sm:$0xff] %vm911_vm8, %v872_v16  ;;  %1365 = vrot.lane.b32.xlu0 %v2945_v10, %s2443_s24  ;;  %v2272_v16 = vrot.slane %v3219_v27, 9 }
  0xcd   : > { %1367 = vrot.lane.b32.xlu1 %v2970_v12, %s2443_s24 }
  0xce   : > { %v1590_v19 = vpop.permute.xlu0 %1589 }
  0xcf   : > { %1635 = vst.msk [vmem:[#allocation2 + $0x18] sm:$0xff] %vm1631_vm15, %v1590_v19  ;;  %v874_v9 = vpop.permute.xlu1 %873  ;;  %v1483_v19 = vrot.slane %v1481_v54, 4 }
  0xd0   : > { %917 = vst.msk [vmem:[#allocation2 + $0x28] sm:$0xff] %vm911_vm8, %v874_v9  ;;  %1435 = vrot.lane.b32.xlu0 %v2930_v4, %s2447_s6  ;;  %v1486_v9 = vrot.slane %v1484_v56, 5 }
  0xd1   : > { %1437 = vrot.lane.b32.xlu1 %v2953_v40, %s2447_s6 }
  0xd2   : > { %v1116_v45 = vpop.permute.xlu0 %1115  ;;  %v1650_v20 = vld [vmem:[#allocation2 + $0x10] sm:$0xff] }
  0xd3   : > { %1160 = vst.msk [vmem:[#allocation2 + $0x20] sm:$0xff] %vm1155_vm9, %v1116_v45  ;;  %v1118_v10 = vpop.permute.xlu1 %1117  ;;  %2329 = vmatprep.mubr.msk.bf16.mxu0 %vm1684_vm0, %v1650_v20  ;;  %v1339_v20 = vrot.slane %v1337_v55, 4 }
  0xd4   : > { %1161 = vst.msk [vmem:[#allocation2 + $0x28] sm:$0xff] %vm1155_vm9, %v1118_v10  ;;  %1527 = vrot.lane.b32.xlu0 %v2977_v23, %s2448_s7  ;;  %v1340_v10 = vrot.slane %v311_v22, 5 }
  0xd5   : > { %1529 = vrot.lane.b32.xlu1 %v3003_v59, %s2448_s7 }
  0xd6   : > { %v1186_v11 = vpop.permute.xlu0 %1185  ;;  %v1651_v4 = vld [vmem:[#allocation2 + $0x18] sm:$0xff] }
  0xd7   : > { %1230 = vst.msk [vmem:[#allocation2 + $0x20] sm:$0xff] %vm1225_vm10, %v1186_v11  ;;  %v1188_v32 = vpop.permute.xlu1 %1187  ;;  %2330 = vmatmul.mubr.msk.bf16.gmra.mrb[4].mxu0 %vm1684_vm0, %v1651_v4  ;;  %v1496_v11 = vrot.slane %v1494_v3, 4 }
  0xd8   : > { %1231 = vst.msk [vmem:[#allocation2 + $0x28] sm:$0xff] %vm1225_vm10, %v1188_v32  ;;  %1603 = vrot.lane.b32.xlu0 %v2970_v12, %s2449_s8  ;;  %v314_v32 = vld [vmem:[%s2499_s22 + $0xd4] sm:$0x1] }
  0xd9   : > { %887 = vrot.lane.b32.xlu1 %v2977_v23, %s2445_s26 }
  0xda   : > { %v1278_v63 = vpop.permute.xlu0 %1277 }
  0xdb   : > { %1322 = vst.msk [vmem:[#allocation2 + $0x20] sm:$0xff] %vm1317_vm11, %v1278_v63  ;;  %v1280_v24 = vpop.permute.xlu1 %1279 }
  0xdc   : > { %1323 = vst.msk [vmem:[#allocation2 + $0x28] sm:$0xff] %vm1317_vm11, %v1280_v24  ;;  %1605 = vrot.lane.b32.xlu0 %v2997_v53, %s2449_s8  ;;  %v1487_v24 = vor.u32 %v1486_v9, %v1483_v19 }
  0xdd   : > { %889 = vrot.lane.b32.xlu1 %v3003_v59, %s2445_s26 }
  0xde   : > { %v1354_v44 = vpop.permute.xlu0 %1353 }
  0xdf   : > { %1398 = vst.msk [vmem:[#allocation2 + $0x20] sm:$0xff] %vm1393_vm12, %v1354_v44  ;;  %v1356_v25 = vpop.permute.xlu1 %1355 }
  0xe0   : > { %1399 = vst.msk [vmem:[#allocation2 + $0x28] sm:$0xff] %vm1393_vm12, %v1356_v25  ;;  %1131 = vrot.lane.b32.xlu0 %v2970_v12, %s2444_s25  ;;  %v1338_v25 = vsel %vm2519_vm5, %v2272_v16, %v1337_v55 }
  0xe1   : > { %1133 = vrot.lane.b32.xlu1 %v2997_v53, %s2444_s25 }
  0xe2   : > { %v1424_v23 = vpop.permute.xlu0 %1423 }
  0xe3   : > { %1468 = vst.msk [vmem:[#allocation2 + $0x20] sm:$0xff] %vm1463_vm13, %v1424_v23  ;;  %v1426_v30 = vpop.permute.xlu1 %1425  ;;  %v1341_v23 = vsel %vm2519_vm5, %v1339_v20, %v1340_v10 }
  0xe4   : > { %1469 = vst.msk [vmem:[#allocation2 + $0x28] sm:$0xff] %vm1463_vm13, %v1426_v30  ;;  %1201 = vrot.lane.b32.xlu0 %v2953_v40, %s2442_s23 }
  0xe5   : > { %1203 = vrot.lane.b32.xlu1 %v2980_v33, %s2442_s23 }
  0xe6   : > { %v1516_v51 = vpop.permute.xlu0 %1515 }
  0xe7   : > { %1560 = vst.msk [vmem:[#allocation2 + $0x20] sm:$0xff] %vm1555_vm14, %v1516_v51  ;;  %v1518_v12 = vpop.permute.xlu1 %1517  ;;  %v1500_v51 = vshll.u32 %v314_v32, 16 }
  0xe8   : > { %1561 = vst.msk [vmem:[#allocation2 + $0x28] sm:$0xff] %vm1555_vm14, %v1518_v12  ;;  %1293 = vrot.lane.b32.xlu0 %v3003_v59, %s2446_s29 }
  0xe9   : > { %1295 = vrot.lane.b32.xlu1 %v3024_v42, %s2446_s29 }
  0xea   : > { %v1592_v14 = vpop.permute.xlu0 %1591 }
  0xeb   : > { %1636 = vst.msk [vmem:[#allocation2 + $0x20] sm:$0xff] %vm1631_vm15, %v1592_v14  ;;  %v876_v40 = vpop.permute.xlu1 %875  ;;  %v1488_v14 = vrot.slane %v1487_v24, 4 }
  0xec   : > { %918 = vst.msk [vmem:[#allocation2 + $0x30] sm:$0xff] %vm911_vm8, %v876_v40  ;;  %1369 = vrot.lane.b32.xlu0 %v2997_v53, %s2443_s24  ;;  %v1246_v53 = vshll.u32 %v3219_v27, 16 }
  0xed   : > { %1371 = vrot.lane.b32.xlu1 %v3026_v49, %s2443_s24 }
  0xee   : > { %v1594_v35 = vpop.permute.xlu0 %1593  ;;  %v1248_v29 = vrot.slane %v1246_v53, 5 }
  0xef   : > { %1637 = vst.msk [vmem:[#allocation2 + $0x28] sm:$0xff] %vm1631_vm15, %v1594_v35  ;;  %v878_v59 = vpop.permute.xlu1 %877  ;;  %v1502_v35 = vrot.slane %v1500_v51, 5 }
  0xf0   : > { %919 = vst.msk [vmem:[#allocation2 + $0x38] sm:$0xff] %vm911_vm8, %v878_v59  ;;  %1439 = vrot.lane.b32.xlu0 %v2980_v33, %s2447_s6  ;;  %v1245_v33 = vrot.slane %v1243_v21, 4 }
  0xf1   : > { %1441 = vrot.lane.b32.xlu1 %v3007_v43, %s2447_s6 }
  0xf2   : > { %v1120_v7 = vpop.permute.xlu0 %1119  ;;  %v1652_v31 = vld [vmem:[#allocation2 + $0x20] sm:$0xff]  ;;  %v1249_v1 = vor.u32 %v1248_v29, %v1245_v33 }
  0xf3   : > { %1162 = vst.msk [vmem:[#allocation2 + $0x30] sm:$0xff] %vm1155_vm9, %v1120_v7  ;;  %v1122_v37 = vpop.permute.xlu1 %1121  ;;  %2333 = vmatprep.mubr.msk.bf16.mxu0 %vm1684_vm0, %v1652_v31  ;;  %v1577_v7 = vrot.slane %v1575_v17, 4  ;;  %v1578_v31 = vrot.slane %v314_v32, 5 }
  0xf4   : > { %1163 = vst.msk [vmem:[#allocation2 + $0x38] sm:$0xff] %vm1155_vm9, %v1122_v37  ;;  %1531 = vrot.lane.b32.xlu0 %v3024_v42, %s2448_s7  ;;  %v1250_v48 = vrot.slane %v1249_v1, 4 }
  0xf5   : > { %1533 = vrot.lane.b32.xlu1 %v3050_v47, %s2448_s7 }
  0xf6   : > { %v1190_v36 = vpop.permute.xlu0 %1189  ;;  %v1653_v6 = vld [vmem:[#allocation2 + $0x28] sm:$0xff]  ;;  %v1255_v15 = vsel %vm2556_vm6, %v1250_v48, %v1254_v0  ;;  %v1579_v0 = vsel %vm2519_vm5, %v1577_v7, %v1578_v31 }
  0xf7   : > { %1232 = vst.msk [vmem:[#allocation2 + $0x30] sm:$0xff] %vm1225_vm10, %v1190_v36  ;;  %v1192_v50 = vpop.permute.xlu1 %1191  ;;  %2334 = vmatmul.mubr.msk.bf16.gmra.mrb[8].mxu0 %vm1684_vm0, %v1653_v6  ;;  %v2277_v36 = vcombine.low %v1576_v52, %v1579_v0 }
  0xf8   : > { %1233 = vst.msk [vmem:[#allocation2 + $0x38] sm:$0xff] %vm1225_vm10, %v1192_v50  ;;  %1607 = vrot.lane.b32.xlu0 %v3026_v49, %s2449_s8 }
  0xf9   : > { %891 = vrot.lane.b32.xlu1 %v3024_v42, %s2445_s26  ;;  %v1260_v42 = vrot.slane %v1259_v60, 4 }
  0xfa   : > { %v1282_v57 = vpop.permute.xlu0 %1281 }
  0xfb   : > { %1324 = vst.msk [vmem:[#allocation2 + $0x30] sm:$0xff] %vm1317_vm11, %v1282_v57  ;;  %v1284_v34 = vpop.permute.xlu1 %1283  ;;  %v1265_v18 = vsel %vm2556_vm6, %v1260_v42, %v1264_v8 }
  0xfc   : > { %1325 = vst.msk [vmem:[#allocation2 + $0x38] sm:$0xff] %vm1317_vm11, %v1284_v34  ;;  %1609 = vrot.lane.b32.xlu0 %v3047_v41, %s2449_s8  ;;  %v2271_v63 = vcombine.low %v1255_v15, %v1265_v18 }
  0xfd   : > { %893 = vrot.lane.b32.xlu1 %v3050_v47, %s2445_s26 }
  0xfe   : > { %v1358_v61 = vpop.permute.xlu0 %1357 }
  0xff   : > { %1400 = vst.msk [vmem:[#allocation2 + $0x30] sm:$0xff] %vm1393_vm12, %v1358_v61  ;;  %v1360_v2 = vpop.permute.xlu1 %1359 }
 0x100   : > { %1401 = vst.msk [vmem:[#allocation2 + $0x38] sm:$0xff] %vm1393_vm12, %v1360_v2  ;;  %1135 = vrot.lane.b32.xlu0 %v3026_v49, %s2444_s25  ;;  %v1492_v49 = vrot.slane %v1490_v46, 5 }
 0x101   : > { %1137 = vrot.lane.b32.xlu1 %v3047_v41, %s2444_s25 }
 0x102   : > { %v1428_v45 = vpop.permute.xlu0 %1427  ;;  %v1497_v30 = vor.u32 %v1496_v11, %v1492_v49  ;;  %v1493_v21 = vsel %vm2556_vm6, %v1488_v14, %v1492_v49 }
 0x103   : > { %1470 = vst.msk [vmem:[#allocation2 + $0x30] sm:$0xff] %vm1463_vm13, %v1428_v45  ;;  %v1430_v4 = vpop.permute.xlu1 %1429 }
 0x104   : > { %1471 = vst.msk [vmem:[#allocation2 + $0x38] sm:$0xff] %vm1463_vm13, %v1430_v4  ;;  %1205 = vrot.lane.b32.xlu0 %v3007_v43, %s2442_s23  ;;  %v2273_v43 = vcombine.low %v1338_v25, %v1341_v23  ;;  %v1498_v27 = vrot.slane %v1497_v30, 4 }
 0x105   : > { %1207 = vrot.lane.b32.xlu1 %v2270_v5, %s2442_s23 }
 0x106   : > { %v1520_v44 = vpop.permute.xlu0 %1519  ;;  %v1503_v62 = vsel %vm2556_vm6, %v1498_v27, %v1502_v35 }
 0x107   : > { %1562 = vst.msk [vmem:[#allocation2 + $0x30] sm:$0xff] %vm1555_vm14, %v1520_v44  ;;  %v1522_v12 = vpop.permute.xlu1 %1521 }
 0x108   : > { %1563 = vst.msk [vmem:[#allocation2 + $0x38] sm:$0xff] %vm1555_vm14, %v1522_v12  ;;  %1297 = vrot.lane.b32.xlu0 %v3050_v47, %s2446_s29  ;;  %v2274_v47 = vcombine.low %v3250_v38, %v3254_v58 }
 0x109   : > { %1299 = vrot.lane.b32.xlu1 %v2271_v63, %s2446_s29 }
 0x10a   : > { %v1596_v40 = vpop.permute.xlu0 %1595 }
 0x10b   : > { %1638 = vst.msk [vmem:[#allocation2 + $0x30] sm:$0xff] %vm1631_vm15, %v1596_v40  ;;  %v880_v59 = vpop.permute.xlu1 %879 }
 0x10c   : > { %920 = vst.msk [vmem:[#allocation2 + $0x40] sm:$0xff] %vm911_vm8, %v880_v59  ;;  %1373 = vrot.lane.b32.xlu0 %v3047_v41, %s2443_s24  ;;  %v2275_v41 = vcombine.low %v1493_v21, %v1503_v62 }
 0x10d   : > { %1375 = vrot.lane.b32.xlu1 %v2273_v43, %s2443_s24  ;;  %s255_s24 = scalar_lea.vmem %s3482_s4, %s3492_s15 }
 0x10e   : > { %v1598_v53 = vpop.permute.xlu0 %1597 }
 0x10f   : > { %1639 = vst.msk [vmem:[#allocation2 + $0x38] sm:$0xff] %vm1631_vm15, %v1598_v53  ;;  %v882_v37 = vpop.permute.xlu1 %881 }
 0x110   : > { %921 = vst.msk [vmem:[#allocation2 + $0x48] sm:$0xff] %vm911_vm8, %v882_v37  ;;  %1443 = vrot.lane.b32.xlu0 %v2270_v5, %s2447_s6 }
 0x111   : > { %1445 = vrot.lane.b32.xlu1 %v2274_v47, %s2447_s6 }
 0x112   : > { %v1124_v33 = vpop.permute.xlu0 %1123  ;;  %v1654_v29 = vld [vmem:[#allocation2 + $0x30] sm:$0xff] }
 0x113   : > { %1164 = vst.msk [vmem:[#allocation2 + $0x40] sm:$0xff] %vm1155_vm9, %v1124_v33  ;;  %v1126_v26 = vpop.permute.xlu1 %1125  ;;  %2337 = vmatprep.mubr.msk.bf16.mxu0 %vm1684_vm0, %v1654_v29 }
 0x114   : > { %1165 = vst.msk [vmem:[#allocation2 + $0x48] sm:$0xff] %vm1155_vm9, %v1126_v26  ;;  %1535 = vrot.lane.b32.xlu0 %v2271_v63, %s2448_s7 }
 0x115   : > { %1537 = vrot.lane.b32.xlu1 %v2275_v41, %s2448_s7 }
 0x116   : > { %v1194_v6 = vpop.permute.xlu0 %1193  ;;  %v1655_v22 = vld [vmem:[#allocation2 + $0x38] sm:$0xff] }
 0x117   : > { %1234 = vst.msk [vmem:[#allocation2 + $0x40] sm:$0xff] %vm1225_vm10, %v1194_v6  ;;  %v1196_v50 = vpop.permute.xlu1 %1195  ;;  %2338 = vmatmul.mubr.msk.bf16.gmra.mrb[12].mxu0 %vm1684_vm0, %v1655_v22 }
 0x118   : > { %1235 = vst.msk [vmem:[#allocation2 + $0x48] sm:$0xff] %vm1225_vm10, %v1196_v50  ;;  %1611 = vrot.lane.b32.xlu0 %v2273_v43, %s2449_s8 }
 0x119   : > { %1613 = vrot.lane.b32.xlu1 %v2277_v36, %s2449_s8 }
 0x11a   : > { %v1286_v13 = vpop.permute.xlu0 %1285 }
 0x11b   : > { %1326 = vst.msk [vmem:[#allocation2 + $0x40] sm:$0xff] %vm1317_vm11, %v1286_v13  ;;  %v1288_v1 = vpop.permute.xlu1 %1287 }
 0x11c   : > { %1327 = vst.msk [vmem:[#allocation2 + $0x48] sm:$0xff] %vm1317_vm11, %v1288_v1 }
 0x11e   : > { %v1362_v60 = vpop.permute.xlu0 %1361 }
 0x11f   : > { %1402 = vst.msk [vmem:[#allocation2 + $0x40] sm:$0xff] %vm1393_vm12, %v1362_v60  ;;  %v1364_v39 = vpop.permute.xlu1 %1363 }
 0x120   : > { %1403 = vst.msk [vmem:[#allocation2 + $0x48] sm:$0xff] %vm1393_vm12, %v1364_v39 }
 0x122   : > { %v1432_v57 = vpop.permute.xlu0 %1431 }
 0x123   : > { %1472 = vst.msk [vmem:[#allocation2 + $0x40] sm:$0xff] %vm1463_vm13, %v1432_v57  ;;  %v1434_v38 = vpop.permute.xlu1 %1433 }
 0x124   : > { %1473 = vst.msk [vmem:[#allocation2 + $0x48] sm:$0xff] %vm1463_vm13, %v1434_v38 }
 0x126   : > { %v1524_v34 = vpop.permute.xlu0 %1523 }
 0x127   : > { %1564 = vst.msk [vmem:[#allocation2 + $0x40] sm:$0xff] %vm1555_vm14, %v1524_v34  ;;  %v1526_v58 = vpop.permute.xlu1 %1525 }
 0x128   : > { %1565 = vst.msk [vmem:[#allocation2 + $0x48] sm:$0xff] %vm1555_vm14, %v1526_v58 }
 0x12a   : > { %v1600_v48 = vpop.permute.xlu0 %1599 }
 0x12b   : > { %1640 = vst.msk [vmem:[#allocation2 + $0x40] sm:$0xff] %vm1631_vm15, %v1600_v48  ;;  %v884_v42 = vpop.permute.xlu1 %883 }
 0x12c   : > { %922 = vst.msk [vmem:[#allocation2 + $0x50] sm:$0xff] %vm911_vm8, %v884_v42 }
 0x12e   : > { %v1602_v8 = vpop.permute.xlu0 %1601 }
 0x12f   : > { %1641 = vst.msk [vmem:[#allocation2 + $0x48] sm:$0xff] %vm1631_vm15, %v1602_v8  ;;  %v886_v54 = vpop.permute.xlu1 %885 }
 0x130   : > { %923 = vst.msk [vmem:[#allocation2 + $0x58] sm:$0xff] %vm911_vm8, %v886_v54 }
 0x132   : > { %v1128_v56 = vpop.permute.xlu0 %1127  ;;  %v1656_v61 = vld [vmem:[#allocation2 + $0x40] sm:$0xff] }
 0x133   : > { %1166 = vst.msk [vmem:[#allocation2 + $0x50] sm:$0xff] %vm1155_vm9, %v1128_v56  ;;  %v1130_v55 = vpop.permute.xlu1 %1129  ;;  %2341 = vmatprep.mubr.msk.bf16.mxu1 %vm1684_vm0, %v1656_v61 }
 0x134   : > { %1167 = vst.msk [vmem:[#allocation2 + $0x58] sm:$0xff] %vm1155_vm9, %v1130_v55 }
 0x136   : > { %v1198_v3 = vpop.permute.xlu0 %1197  ;;  %v1657_v46 = vld [vmem:[#allocation2 + $0x48] sm:$0xff] }
 0x137   : > { %1236 = vst.msk [vmem:[#allocation2 + $0x50] sm:$0xff] %vm1225_vm10, %v1198_v3  ;;  %v1200_v2 = vpop.permute.xlu1 %1199  ;;  %2342 = vmatmul.mubr.msk.bf16.vlgmr.msra.gmra.mrb[0].mxu1 %vm1684_vm0, %v1657_v46 }
 0x138   : > { %1237 = vst.msk [vmem:[#allocation2 + $0x58] sm:$0xff] %vm1225_vm10, %v1200_v2 }
 0x13a   : > { %v1290_v5 = vpop.permute.xlu0 %1289 }
 0x13b   : > { %1328 = vst.msk [vmem:[#allocation2 + $0x50] sm:$0xff] %vm1317_vm11, %v1290_v5  ;;  %v1292_v15 = vpop.permute.xlu1 %1291 }
 0x13c   : > { %1329 = vst.msk [vmem:[#allocation2 + $0x58] sm:$0xff] %vm1317_vm11, %v1292_v15 }
 0x13e   : > { %v1366_v18 = vpop.permute.xlu0 %1365 }
 0x13f   : > { %1404 = vst.msk [vmem:[#allocation2 + $0x50] sm:$0xff] %vm1393_vm12, %v1366_v18  ;;  %v1368_v16 = vpop.permute.xlu1 %1367 }
 0x140   : > { %1405 = vst.msk [vmem:[#allocation2 + $0x58] sm:$0xff] %vm1393_vm12, %v1368_v16 }
 0x142   : > { %v1436_v19 = vpop.permute.xlu0 %1435 }
 0x143   : > { %1474 = vst.msk [vmem:[#allocation2 + $0x50] sm:$0xff] %vm1463_vm13, %v1436_v19  ;;  %v1438_v9 = vpop.permute.xlu1 %1437 }
 0x144   : > { %1475 = vst.msk [vmem:[#allocation2 + $0x58] sm:$0xff] %vm1463_vm13, %v1438_v9 }
 0x146   : > { %v1528_v45 = vpop.permute.xlu0 %1527 }
 0x147   : > { %1566 = vst.msk [vmem:[#allocation2 + $0x50] sm:$0xff] %vm1555_vm14, %v1528_v45  ;;  %v1530_v20 = vpop.permute.xlu1 %1529 }
 0x148   : > { %1567 = vst.msk [vmem:[#allocation2 + $0x58] sm:$0xff] %vm1555_vm14, %v1530_v20 }
 0x14a   : > { %v1604_v10 = vpop.permute.xlu0 %1603 }
 0x14b   : > { %1642 = vst.msk [vmem:[#allocation2 + $0x50] sm:$0xff] %vm1631_vm15, %v1604_v10  ;;  %v888_v49 = vpop.permute.xlu1 %887 }
 0x14c   : > { %924 = vst.msk [vmem:[#allocation2 + $0x60] sm:$0xff] %vm911_vm8, %v888_v49 }
 0x14e   : > { %v1606_v11 = vpop.permute.xlu0 %1605 }
 0x14f   : > { %1643 = vst.msk [vmem:[#allocation2 + $0x58] sm:$0xff] %vm1631_vm15, %v1606_v11  ;;  %v890_v4 = vpop.permute.xlu1 %889 }
 0x150   : > { %925 = vst.msk [vmem:[#allocation2 + $0x68] sm:$0xff] %vm911_vm8, %v890_v4 }
 0x152   : > { %v1132_v32 = vpop.permute.xlu0 %1131  ;;  %v1658_v63 = vld [vmem:[#allocation2 + $0x50] sm:$0xff] }
 0x153   : > { %1168 = vst.msk [vmem:[#allocation2 + $0x60] sm:$0xff] %vm1155_vm9, %v1132_v32  ;;  %v1134_v24 = vpop.permute.xlu1 %1133  ;;  %2345 = vmatprep.mubr.msk.bf16.mxu1 %vm1684_vm0, %v1658_v63 }
 0x154   : > { %1169 = vst.msk [vmem:[#allocation2 + $0x68] sm:$0xff] %vm1155_vm9, %v1134_v24 }
 0x156   : > { %v1202_v44 = vpop.permute.xlu0 %1201  ;;  %v1659_v25 = vld [vmem:[#allocation2 + $0x58] sm:$0xff] }
 0x157   : > { %1238 = vst.msk [vmem:[#allocation2 + $0x60] sm:$0xff] %vm1225_vm10, %v1202_v44  ;;  %v1204_v23 = vpop.permute.xlu1 %1203  ;;  %2346 = vmatmul.mubr.msk.bf16.gmra.mrb[4].mxu1 %vm1684_vm0, %v1659_v25 }
 0x158   : > { %1239 = vst.msk [vmem:[#allocation2 + $0x68] sm:$0xff] %vm1225_vm10, %v1204_v23 }
 0x15a   : > { %v1294_v30 = vpop.permute.xlu0 %1293 }
 0x15b   : > { %1330 = vst.msk [vmem:[#allocation2 + $0x60] sm:$0xff] %vm1317_vm11, %v1294_v30  ;;  %v1296_v51 = vpop.permute.xlu1 %1295 }
 0x15c   : > { %1331 = vst.msk [vmem:[#allocation2 + $0x68] sm:$0xff] %vm1317_vm11, %v1296_v51 }
 0x15e   : > { %v1370_v12 = vpop.permute.xlu0 %1369 }
 0x15f   : > { %1406 = vst.msk [vmem:[#allocation2 + $0x60] sm:$0xff] %vm1393_vm12, %v1370_v12  ;;  %v1372_v43 = vpop.permute.xlu1 %1371 }
 0x160   : > { %1407 = vst.msk [vmem:[#allocation2 + $0x68] sm:$0xff] %vm1393_vm12, %v1372_v43 }
 0x162   : > { %v1440_v14 = vpop.permute.xlu0 %1439 }
 0x163   : > { %1476 = vst.msk [vmem:[#allocation2 + $0x60] sm:$0xff] %vm1463_vm13, %v1440_v14  ;;  %v1442_v40 = vpop.permute.xlu1 %1441 }
 0x164   : > { %1477 = vst.msk [vmem:[#allocation2 + $0x68] sm:$0xff] %vm1463_vm13, %v1442_v40 }
 0x166   : > { %v1532_v27 = vpop.permute.xlu0 %1531 }
 0x167   : > { %1568 = vst.msk [vmem:[#allocation2 + $0x60] sm:$0xff] %vm1555_vm14, %v1532_v27  ;;  %v1534_v35 = vpop.permute.xlu1 %1533 }
 0x168   : > { %1569 = vst.msk [vmem:[#allocation2 + $0x68] sm:$0xff] %vm1555_vm14, %v1534_v35 }
 0x16a   : > { %v1608_v17 = vpop.permute.xlu0 %1607 }
 0x16b   : > { %1644 = vst.msk [vmem:[#allocation2 + $0x60] sm:$0xff] %vm1631_vm15, %v1608_v17  ;;  %v892_v59 = vpop.permute.xlu1 %891 }
 0x16c   : > { %926 = vst.msk [vmem:[#allocation2 + $0x70] sm:$0xff] %vm911_vm8, %v892_v59 }
 0x16e   : > { %v1610_v47 = vpop.permute.xlu0 %1609 }
 0x16f   : > { %1645 = vst.msk [vmem:[#allocation2 + $0x68] sm:$0xff] %vm1631_vm15, %v1610_v47  ;;  %v894_v21 = vpop.permute.xlu1 %893 }
 0x170   : > { %927 = vst.msk [vmem:[#allocation2 + $0x78] sm:$0xff] %vm911_vm8, %v894_v21 }
 0x172   : > { %v1136_v53 = vpop.permute.xlu0 %1135  ;;  %v1660_v62 = vld [vmem:[#allocation2 + $0x60] sm:$0xff] }
 0x173   : > { %1170 = vst.msk [vmem:[#allocation2 + $0x70] sm:$0xff] %vm1155_vm9, %v1136_v53  ;;  %v1138_v28 = vpop.permute.xlu1 %1137  ;;  %2349 = vmatprep.mubr.msk.bf16.mxu1 %vm1684_vm0, %v1660_v62 }
 0x174   : > { %1171 = vst.msk [vmem:[#allocation2 + $0x78] sm:$0xff] %vm1155_vm9, %v1138_v28 }
 0x176   : > { %v1206_v7 = vpop.permute.xlu0 %1205  ;;  %v1661_v31 = vld [vmem:[#allocation2 + $0x68] sm:$0xff] }
 0x177   : > { %1240 = vst.msk [vmem:[#allocation2 + $0x70] sm:$0xff] %vm1225_vm10, %v1206_v7  ;;  %v1208_v37 = vpop.permute.xlu1 %1207  ;;  %2350 = vmatmul.mubr.msk.bf16.gmra.mrb[8].mxu1 %vm1684_vm0, %v1661_v31 }
 0x178   : > { %1241 = vst.msk [vmem:[#allocation2 + $0x78] sm:$0xff] %vm1225_vm10, %v1208_v37 }
 0x17a   : > { %v1298_v41 = vpop.permute.xlu0 %1297 }
 0x17b   : > { %1332 = vst.msk [vmem:[#allocation2 + $0x70] sm:$0xff] %vm1317_vm11, %v1298_v41  ;;  %v1300_v33 = vpop.permute.xlu1 %1299 }
 0x17c   : > { %1333 = vst.msk [vmem:[#allocation2 + $0x78] sm:$0xff] %vm1317_vm11, %v1300_v33 }
 0x17e   : > { %v1374_v29 = vpop.permute.xlu0 %1373 }
 0x17f   : > { %1408 = vst.msk [vmem:[#allocation2 + $0x70] sm:$0xff] %vm1393_vm12, %v1374_v29  ;;  %v1376_v52 = vpop.permute.xlu1 %1375 }
 0x180   : > { %1409 = vst.msk [vmem:[#allocation2 + $0x78] sm:$0xff] %vm1393_vm12, %v1376_v52 }
 0x182   : > { %v1444_v0 = vpop.permute.xlu0 %1443 }
 0x183   : > { %1478 = vst.msk [vmem:[#allocation2 + $0x70] sm:$0xff] %vm1463_vm13, %v1444_v0  ;;  %v1446_v26 = vpop.permute.xlu1 %1445 }
 0x184   : > { %1479 = vst.msk [vmem:[#allocation2 + $0x78] sm:$0xff] %vm1463_vm13, %v1446_v26 }
 0x186   : > { %v1536_v36 = vpop.permute.xlu0 %1535 }
 0x187   : > { %1570 = vst.msk [vmem:[#allocation2 + $0x70] sm:$0xff] %vm1555_vm14, %v1536_v36  ;;  %v1538_v6 = vpop.permute.xlu1 %1537 }
 0x188   : > { %1571 = vst.msk [vmem:[#allocation2 + $0x78] sm:$0xff] %vm1555_vm14, %v1538_v6 }
 0x18a   : > { %v1612_v22 = vpop.permute.xlu0 %1611  ;;  %v2327_v50 = vpop.f32.mrb[0].mxu0 }
 0x18b   : > { %1646 = vst.msk [vmem:[#allocation2 + $0x70] sm:$0xff] %vm1631_vm15, %v1612_v22  ;;  %v1614_v13 = vpop.permute.xlu1 %1613  ;;  %v1771_v1 = vpop.f32.mrb[1].mxu0  ;;  %v1971_v58 = vmul.f32 %v2327_v50, %v2327_v50 }
 0x18c   : > { %1901 = vst.msk [vmem:[%s3391_s14 + $0x10] sm:$0xff] %vm1898_vm1, %v2327_v50  ;;  %1899 = vst.msk [vmem:[%s3391_s14] sm:$0xff] %vm1898_vm1, %v1771_v1  ;;  %v2328_v60 = vpop.f32.mrb[2].mxu0  ;;  %v1969_v57 = vmul.f32 %v1771_v1, %v1771_v1 }
 0x18d   : > { %1647 = vst.msk [vmem:[#allocation2 + $0x78] sm:$0xff] %vm1631_vm15, %v1614_v13  ;;  %v1774_v39 = vpop.f32.mrb[3].mxu0  ;;  %v1972_v8 = vmul.f32 %v2328_v60, %v2328_v60 }
 0x18e   : > { %1902 = vst.msk [vmem:[%s3391_s14 + $0x18] sm:$0xff] %vm1898_vm1, %v2328_v60  ;;  %1900 = vst.msk [vmem:[%s3391_s14 + $0x8] sm:$0xff] %vm1898_vm1, %v1774_v39  ;;  %v1931_v38 = vadd.f32 %v1774_v39, %v1771_v1  ;;  %v1970_v34 = vmul.f32 %v1774_v39, %v1774_v39 }
 0x190   : > { %v1932_v48 = vadd.f32 %v2327_v50, %v1931_v38  ;;  %v2001_v42 = vadd.f32 %v1970_v34, %v1969_v57 }
 0x192   : > { %v2002_v54 = vadd.f32 %v2001_v42, %v1971_v58  ;;  %v1662_v56 = vld [vmem:[#allocation2 + $0x70] sm:$0xff]  ;;  %v1933_v61 = vadd.f32 %v2328_v60, %v1932_v48 }
 0x193   : > { %2353 = vmatprep.mubr.msk.bf16.mxu1 %vm1684_vm0, %v1662_v56 }
 0x194   : > { %v1663_v55 = vld [vmem:[#allocation2 + $0x78] sm:$0xff]  ;;  %v2003_v3 = vadd.f32 %v2002_v54, %v1972_v8 }
 0x195   : > { %2354 = vmatmul.mubr.msk.bf16.gmra.mrb[12].mxu1 %vm1684_vm0, %v1663_v55 }
 0x1aa   : > { %v2331_v46 = vpop.f32.mrb[4].mxu0 }
 0x1ab   : > { %1905 = vst.msk [vmem:[%s3391_s14 + $0x30] sm:$0xff] %vm1898_vm1, %v2331_v46  ;;  %v1787_v2 = vpop.f32.mrb[5].mxu0  ;;  %v1975_v20 = vmul.f32 %v2331_v46, %v2331_v46 }
 0x1ac   : > { %1903 = vst.msk [vmem:[%s3391_s14 + $0x20] sm:$0xff] %vm1898_vm1, %v1787_v2  ;;  %v1934_v5 = vadd.f32 %v1933_v61, %v1787_v2  ;;  %v1973_v15 = vmul.f32 %v1787_v2, %v1787_v2  ;;  %v2332_v18 = vpop.f32.mrb[6].mxu0 }
 0x1ad   : > { %1906 = vst.msk [vmem:[%s3391_s14 + $0x38] sm:$0xff] %vm1898_vm1, %v2332_v18  ;;  %v1790_v16 = vpop.f32.mrb[7].mxu0  ;;  %v1976_v11 = vmul.f32 %v2332_v18, %v2332_v18 }
 0x1ae   : > { %v2004_v19 = vadd.f32 %v2003_v3, %v1973_v15  ;;  %1904 = vst.msk [vmem:[%s3391_s14 + $0x28] sm:$0xff] %vm1898_vm1, %v1790_v16  ;;  %v1935_v9 = vadd.f32 %v1934_v5, %v1790_v16  ;;  %v1974_v45 = vmul.f32 %v1790_v16, %v1790_v16 }
 0x1b0   : > { %v1936_v10 = vadd.f32 %v2331_v46, %v1935_v9  ;;  %v2005_v49 = vadd.f32 %v2004_v19, %v1974_v45 }
 0x1b2   : > { %v2006_v4 = vadd.f32 %v2005_v49, %v1975_v20  ;;  %v1937_v32 = vadd.f32 %v2332_v18, %v1936_v10 }
 0x1b4   : > { %v2007_v63 = vadd.f32 %v2006_v4, %v1976_v11 }
 0x1ca   : > { %v2335_v24 = vpop.f32.mrb[8].mxu0 }
 0x1cb   : > { %1909 = vst.msk [vmem:[%s3391_s14 + $0x50] sm:$0xff] %vm1898_vm1, %v2335_v24  ;;  %v1803_v44 = vpop.f32.mrb[9].mxu0  ;;  %v1979_v40 = vmul.f32 %v2335_v24, %v2335_v24 }
 0x1cc   : > { %1907 = vst.msk [vmem:[%s3391_s14 + $0x40] sm:$0xff] %vm1898_vm1, %v1803_v44  ;;  %v1938_v25 = vadd.f32 %v1937_v32, %v1803_v44  ;;  %v1977_v23 = vmul.f32 %v1803_v44, %v1803_v44  ;;  %v2336_v30 = vpop.f32.mrb[10].mxu0 }
 0x1cd   : > { %1910 = vst.msk [vmem:[%s3391_s14 + $0x58] sm:$0xff] %vm1898_vm1, %v2336_v30  ;;  %v1806_v51 = vpop.f32.mrb[11].mxu0  ;;  %v1980_v17 = vmul.f32 %v2336_v30, %v2336_v30 }
 0x1ce   : > { %v2008_v12 = vadd.f32 %v2007_v63, %v1977_v23  ;;  %1908 = vst.msk [vmem:[%s3391_s14 + $0x48] sm:$0xff] %vm1898_vm1, %v1806_v51  ;;  %v1939_v43 = vadd.f32 %v1938_v25, %v1806_v51  ;;  %v1978_v14 = vmul.f32 %v1806_v51, %v1806_v51 }
 0x1d0   : > { %v1940_v27 = vadd.f32 %v2335_v24, %v1939_v43  ;;  %v2009_v35 = vadd.f32 %v2008_v12, %v1978_v14 }
 0x1d2   : > { %v2010_v59 = vadd.f32 %v2009_v35, %v1979_v40  ;;  %v1941_v47 = vadd.f32 %v2336_v30, %v1940_v27 }
 0x1d4   : > { %v2011_v21 = vadd.f32 %v2010_v59, %v1980_v17 }
 0x1ea   : > { %v2339_v53 = vpop.f32.mrb[12].mxu0 }
 0x1eb   : > { %1913 = vst.msk [vmem:[%s3391_s14 + $0x70] sm:$0xff] %vm1898_vm1, %v2339_v53  ;;  %v1819_v62 = vpop.f32.mrb[13].mxu0  ;;  %v1983_v52 = vmul.f32 %v2339_v53, %v2339_v53 }
 0x1ec   : > { %1911 = vst.msk [vmem:[%s3391_s14 + $0x60] sm:$0xff] %vm1898_vm1, %v1819_v62  ;;  %v1942_v28 = vadd.f32 %v1941_v47, %v1819_v62  ;;  %v1981_v7 = vmul.f32 %v1819_v62, %v1819_v62  ;;  %v2340_v31 = vpop.f32.mrb[14].mxu0 }
 0x1ed   : > { %1914 = vst.msk [vmem:[%s3391_s14 + $0x78] sm:$0xff] %vm1898_vm1, %v2340_v31  ;;  %v1822_v37 = vpop.f32.mrb[15].mxu0  ;;  %v1984_v36 = vmul.f32 %v2340_v31, %v2340_v31 }
 0x1ee   : > { %v2012_v41 = vadd.f32 %v2011_v21, %v1981_v7  ;;  %1912 = vst.msk [vmem:[%s3391_s14 + $0x68] sm:$0xff] %vm1898_vm1, %v1822_v37  ;;  %v1943_v33 = vadd.f32 %v1942_v28, %v1822_v37  ;;  %v1982_v29 = vmul.f32 %v1822_v37, %v1822_v37 }
 0x1f0   : > { %v1944_v0 = vadd.f32 %v2339_v53, %v1943_v33  ;;  %v2013_v26 = vadd.f32 %v2012_v41, %v1982_v29 }
 0x1f2   : > { %v2014_v6 = vadd.f32 %v2013_v26, %v1983_v52  ;;  %v1945_v22 = vadd.f32 %v2340_v31, %v1944_v0 }
 0x1f4   : > { %v2015_v50 = vadd.f32 %v2014_v6, %v1984_v36 }
 0x20a   : > { %v2343_v13 = vpop.f32.mrb[0].mxu1 }
 0x20b   : > { %1917 = vst.msk [vmem:[%s3391_s14 + $0x90] sm:$0xff] %vm1898_vm1, %v2343_v13  ;;  %v1835_v1 = vpop.f32.mrb[1].mxu1  ;;  %v1987_v42 = vmul.f32 %v2343_v13, %v2343_v13 }
 0x20c   : > { %1915 = vst.msk [vmem:[%s3391_s14 + $0x80] sm:$0xff] %vm1898_vm1, %v1835_v1  ;;  %v1946_v60 = vadd.f32 %v1945_v22, %v1835_v1  ;;  %v1985_v39 = vmul.f32 %v1835_v1, %v1835_v1  ;;  %v2344_v57 = vpop.f32.mrb[2].mxu1 }
 0x20d   : > { %1918 = vst.msk [vmem:[%s3391_s14 + $0x98] sm:$0xff] %vm1898_vm1, %v2344_v57  ;;  %v1838_v38 = vpop.f32.mrb[3].mxu1  ;;  %v1988_v56 = vmul.f32 %v2344_v57, %v2344_v57 }
 0x20e   : > { %v2016_v34 = vadd.f32 %v2015_v50, %v1985_v39  ;;  %1916 = vst.msk [vmem:[%s3391_s14 + $0x88] sm:$0xff] %vm1898_vm1, %v1838_v38  ;;  %v1947_v58 = vadd.f32 %v1946_v60, %v1838_v38  ;;  %v1986_v48 = vmul.f32 %v1838_v38, %v1838_v38 }
 0x210   : > { %v1948_v8 = vadd.f32 %v2343_v13, %v1947_v58  ;;  %v2017_v54 = vadd.f32 %v2016_v34, %v1986_v48 }
 0x212   : > { %v2018_v61 = vadd.f32 %v2017_v54, %v1987_v42  ;;  %v1949_v55 = vadd.f32 %v2344_v57, %v1948_v8 }
 0x214   : > { %v2019_v3 = vadd.f32 %v2018_v61, %v1988_v56 }
 0x22a   : > { %v2347_v46 = vpop.f32.mrb[4].mxu1 }
 0x22b   : > { %1921 = vst.msk [vmem:[%s3391_s14 + $0xb0] sm:$0xff] %vm1898_vm1, %v2347_v46  ;;  %v1851_v2 = vpop.f32.mrb[5].mxu1  ;;  %v1991_v20 = vmul.f32 %v2347_v46, %v2347_v46 }
 0x22c   : > { %1919 = vst.msk [vmem:[%s3391_s14 + $0xa0] sm:$0xff] %vm1898_vm1, %v1851_v2  ;;  %v1950_v5 = vadd.f32 %v1949_v55, %v1851_v2  ;;  %v1989_v15 = vmul.f32 %v1851_v2, %v1851_v2  ;;  %v2348_v18 = vpop.f32.mrb[6].mxu1 }
 0x22d   : > { %1922 = vst.msk [vmem:[%s3391_s14 + $0xb8] sm:$0xff] %vm1898_vm1, %v2348_v18  ;;  %v1854_v16 = vpop.f32.mrb[7].mxu1  ;;  %v1992_v11 = vmul.f32 %v2348_v18, %v2348_v18 }
 0x22e   : > { %v2020_v19 = vadd.f32 %v2019_v3, %v1989_v15  ;;  %1920 = vst.msk [vmem:[%s3391_s14 + $0xa8] sm:$0xff] %vm1898_vm1, %v1854_v16  ;;  %v1951_v9 = vadd.f32 %v1950_v5, %v1854_v16  ;;  %v1990_v45 = vmul.f32 %v1854_v16, %v1854_v16 }
 0x230   : > { %v1952_v10 = vadd.f32 %v2347_v46, %v1951_v9  ;;  %v2021_v49 = vadd.f32 %v2020_v19, %v1990_v45 }
 0x232   : > { %v2022_v4 = vadd.f32 %v2021_v49, %v1991_v20  ;;  %v1953_v32 = vadd.f32 %v2348_v18, %v1952_v10 }
 0x234   : > { %v2023_v63 = vadd.f32 %v2022_v4, %v1992_v11 }
 0x24a   : > { %v2351_v24 = vpop.f32.mrb[8].mxu1 }
 0x24b   : > { %1925 = vst.msk [vmem:[%s3391_s14 + $0xd0] sm:$0xff] %vm1898_vm1, %v2351_v24  ;;  %v1867_v44 = vpop.f32.mrb[9].mxu1  ;;  %v1995_v40 = vmul.f32 %v2351_v24, %v2351_v24 }
 0x24c   : > { %1923 = vst.msk [vmem:[%s3391_s14 + $0xc0] sm:$0xff] %vm1898_vm1, %v1867_v44  ;;  %v1954_v25 = vadd.f32 %v1953_v32, %v1867_v44  ;;  %v1993_v23 = vmul.f32 %v1867_v44, %v1867_v44  ;;  %v2352_v30 = vpop.f32.mrb[10].mxu1 }
 0x24d   : > { %1926 = vst.msk [vmem:[%s3391_s14 + $0xd8] sm:$0xff] %vm1898_vm1, %v2352_v30  ;;  %v1870_v51 = vpop.f32.mrb[11].mxu1  ;;  %v1996_v17 = vmul.f32 %v2352_v30, %v2352_v30 }
 0x24e   : > { %v2024_v12 = vadd.f32 %v2023_v63, %v1993_v23  ;;  %1924 = vst.msk [vmem:[%s3391_s14 + $0xc8] sm:$0xff] %vm1898_vm1, %v1870_v51  ;;  %v1955_v43 = vadd.f32 %v1954_v25, %v1870_v51  ;;  %v1994_v14 = vmul.f32 %v1870_v51, %v1870_v51 }
 0x250   : > { %v1956_v27 = vadd.f32 %v2351_v24, %v1955_v43  ;;  %v2025_v35 = vadd.f32 %v2024_v12, %v1994_v14 }
 0x252   : > { %v2026_v59 = vadd.f32 %v2025_v35, %v1995_v40  ;;  %v1957_v47 = vadd.f32 %v2352_v30, %v1956_v27 }
 0x254   : > { %v2027_v21 = vadd.f32 %v2026_v59, %v1996_v17 }
 0x268   : > { %v2355_v53 = vpop.f32.mrb[12].mxu1 }
 0x269   : > { %1929 = vst.msk [vmem:[%s3391_s14 + $0xf0] sm:$0xff] %vm1898_vm1, %v2355_v53  ;;  %v1883_v62 = vpop.f32.mrb[13].mxu1  ;;  %v1999_v52 = vmul.f32 %v2355_v53, %v2355_v53 }
 0x26a   : > { %1927 = vst.msk [vmem:[%s3391_s14 + $0xe0] sm:$0xff] %vm1898_vm1, %v1883_v62  ;;  %v1958_v28 = vadd.f32 %v1957_v47, %v1883_v62  ;;  %v1997_v7 = vmul.f32 %v1883_v62, %v1883_v62  ;;  %v2356_v31 = vpop.f32.mrb[14].mxu1 }
 0x26b   : > { %1930 = vst.msk [vmem:[%s3391_s14 + $0xf8] sm:$0xff] %vm1898_vm1, %v2356_v31  ;;  %v1886_v37 = vpop.f32.mrb[15].mxu1  ;;  %v2000_v36 = vmul.f32 %v2356_v31, %v2356_v31 }
 0x26c   : > { %v2028_v41 = vadd.f32 %v2027_v21, %v1997_v7  ;;  %1928 = vst.msk [vmem:[%s3391_s14 + $0xe8] sm:$0xff] %vm1898_vm1, %v1886_v37  ;;  %v1959_v33 = vadd.f32 %v1958_v28, %v1886_v37  ;;  %v1998_v29 = vmul.f32 %v1886_v37, %v1886_v37 }
 0x26e   : > { %v1960_v0 = vadd.f32 %v2355_v53, %v1959_v33  ;;  %v2029_v26 = vadd.f32 %v2028_v41, %v1998_v29 }
 0x270   : > { %v1961_v6 = vadd.f32 %v2356_v31, %v1960_v0  ;;  %v2030_v22 = vadd.f32 %v2029_v26, %v1999_v52 }
 0x272   : > { %v1962_v50 = vrot.slane %v1961_v6, 4  ;;  %v2031_v13 = vadd.f32 %v2030_v22, %v2000_v36 }
 0x274   : > { %v1963_v1 = vadd.f32 %v1962_v50, %v1961_v6  ;;  %v2032_v60 = vrot.slane %v2031_v13, 4 }
 0x276   : > { %v1964_v39 = vrot.slane %v1963_v1, 2  ;;  %v2033_v57 = vadd.f32 %v2032_v60, %v2031_v13 }
 0x278   : > { %v1965_v38 = vadd.f32 %v1964_v39, %v1963_v1  ;;  %v2034_v34 = vrot.slane %v2033_v57, 2 }
 0x27a   : > { %v1966_v58 = vrot.slane %v1965_v38, 1  ;;  %v2035_v48 = vadd.f32 %v2034_v34, %v2033_v57 }
 0x27c   : > { %v1967_v42 = vadd.f32 %v1966_v58, %v1965_v38  ;;  %v2036_v8 = vrot.slane %v2035_v48, 1 }
 0x27e   : > { %1968 = vst [vmem:[%s249_s21] sm:$0x1] %v1967_v42  ;;  %v2037_v54 = vadd.f32 %v2036_v8, %v2035_v48 }
 0x280   : > { %2038 = vst [vmem:[%s255_s24] sm:$0x1] %v2037_v54 }
 0x281 PF: > { %s15_s17 = sadd.s32 1, %s2440_s17   ;;  %s3487_s15 = smov %s2436_s16 }
 0x282   : > { %p12_p5 = scmp.ge.s32.totalorder %s15_s17, 4   ;;  %s3488_s16 = smov %s3490_s18 }
 0x284   :  { %14 = sbr.rel (!%p12_p5) target bundleno = 2 (0x2), region = 83 }

</bundles_post_ra>
